<compile_context>
chip_gen: v7x
topology: tpu7x:2x2x1
jax: 0.10.0
libtpu: 0.0.40
codegen_flags: <defaults>
</compile_context>

<pallas_src>
import functools

import numpy as np
import jax
import jax.numpy as jnp
from jax import lax
from jax.experimental import pallas as pl
from jax.experimental.pallas import tpu as pltpu

DT = 0.5       # module defaults
DX = 0.01
MU_UP = 1e-3


# ----------------------------------------------------------------------------
# Host-side glue: H-direction circulant stencil operator + lane metadata
# ----------------------------------------------------------------------------
def _circulant(n, entries, dtype=np.float32):
    """M[i, (i+off) % n] = coeff  so that  (M @ x)[i] = sum_off coeff * x[i+off]."""
    m = np.zeros((n, n), dtype=dtype)
    rows = np.arange(n)
    for off, c in entries:
        m[rows, (rows + off) % n] += c
    return m


def make_h_operator(H, dx):
    """Fused left operator [Dh ; Lh] (2H, H): 4th-order d/dH and 1-D d2/dH2."""
    d_entries = [(-2, 1.0 / 12), (-1, -8.0 / 12), (1, 8.0 / 12), (2, -1.0 / 12)]
    l_entries = [(-2, -1.0 / 12), (-1, 4.0 / 3), (0, -5.0 / 2), (1, 4.0 / 3), (2, -1.0 / 12)]
    Dh = _circulant(H, [(o, c / dx) for o, c in d_entries])
    Lh = _circulant(H, [(o, c / dx ** 2) for o, c in l_entries])
    return jnp.asarray(np.concatenate([Dh, Lh], axis=0), dtype=jnp.float32)


def make_wcol(B, W):
    """Per-lane 'w' coordinate of the (H, 2*B*W) slab; lanes ordered (channel, batch, w)."""
    return jnp.asarray(np.tile(np.arange(W, dtype=np.int32), 2 * B)[None, :])


# ----------------------------------------------------------------------------
# Pallas kernel: n_steps fused RK4 steps on the whole batch, state in vregs
# ----------------------------------------------------------------------------
def _rcnn_rk4_kernel(params_ref, x_ref, dl_ref, wcol_ref, o_ref, *, W, dx, dt, n_steps):
    nu = params_ref[0]
    UA = params_ref[1]
    UB = params_ref[2]
    VA = params_ref[3]
    VB = params_ref[4]

    H, L = x_ref.shape          # L = 2 * B * W
    BW = L // 2

    DL = dl_ref[...]            # (2H, H)  [Dh ; Lh] circulant operators

    # ---- loop-invariant lane metadata (hoisted out of the RK4 chain) -------
    wfull = jnp.broadcast_to(wcol_ref[...], (H, L))          # w coordinate per lane
    lane = lax.broadcasted_iota(jnp.int32, (H, L), 1)
    chan_u = lane < BW                                        # first half lanes = U planes
    m_p1 = wfull < 1
    m_p2 = wfull < 2
    m_m1 = wfull >= (W - 1)
    m_m2 = wfull >= (W - 2)
    A = jnp.where(chan_u, UA, VA)                             # per-lane advection coeffs
    Bc = jnp.where(chan_u, UB, VB)

    inv12dx = 1.0 / (12.0 * dx)
    invdx2 = 1.0 / (dx * dx)

    def wshift(X, s, mask):
        # Per-plane periodic roll along lanes: out[:, p*W + j] = X[:, p*W + (j - s) % W].
        # One whole-axis XLU roll + one boundary-correcting roll + select.
        if s > 0:
            main = pltpu.roll(X, s, axis=1)
            corr = pltpu.roll(X, (s - W) % L, axis=1)
        else:
            main = pltpu.roll(X, (L + s) % L, axis=1)
            corr = pltpu.roll(X, (W + s) % L, axis=1)
        return jnp.where(mask, corr, main)

    def rhs(X):
        # H-direction derivative + 1-D laplacian: one fused left matmul (tiny MXU op).
        Lmm = jnp.dot(DL, X, preferred_element_type=jnp.float32,
                      precision=lax.Precision.HIGHEST)        # (2H, L)
        dH = Lmm[:H, :]
        lapH = Lmm[H:, :]
        # W-direction via per-plane periodic lane rolls (exact f32, XLU + VPU only).
        wp1 = wshift(X, 1, m_p1)     # X[:, j-1]
        wp2 = wshift(X, 2, m_p2)     # X[:, j-2]
        wm1 = wshift(X, -1, m_m1)    # X[:, j+1]
        wm2 = wshift(X, -2, m_m2)    # X[:, j+2]
        dW = (wp2 - 8.0 * wp1 + 8.0 * wm1 - wm2) * inv12dx
        lapW = ((-1.0 / 12.0) * (wp2 + wm2) + (4.0 / 3.0) * (wp1 + wm1) - 2.5 * X) * invdx2
        lap = lapH + lapW            # full 2-D laplacian (center weight -5/dx^2 total)
        # Lane-tiled U and V so the advection terms are single full-width products.
        Xr = pltpu.roll(X, BW, axis=1)                        # [V | U]
        U_rep = jnp.where(chan_u, X, Xr)                      # [U | U]
        V_rep = jnp.where(chan_u, Xr, X)                      # [V | V]
        return nu * lap + A * U_rep * dH + Bc * V_rep * dW

    def rk4_step(X):
        k1 = rhs(X)
        k2 = rhs(X + (0.5 * dt) * k1)
        k3 = rhs(X + (0.5 * dt) * k2)
        k4 = rhs(X + dt * k3)
        return X + (dt / 6.0) * (k1 + 2.0 * (k2 + k3) + k4)

    X = x_ref[...]
    if n_steps == 1:
        X = rk4_step(X)
    else:
        X = lax.fori_loop(0, n_steps, lambda _, Xc: rk4_step(Xc), X)
    o_ref[...] = X        # single lane-dense full-width store


@functools.partial(jax.jit, static_argnames=("dt", "dx", "n_steps"))
def rcnn_cell_forward(h, params, DL, wcol, *, dt=DT, dx=DX, n_steps=1):
    """n_steps fused RK4 steps of the RCNNCell; n_steps=1 == torch forward()."""
    B, C, H, W = h.shape
    assert C == 2
    L = 2 * B * W

    # Lane-dense layout: (B, 2, H, W) -> (H, 2*B*W); lanes ordered (channel, batch, w).
    x = jnp.transpose(h, (2, 1, 0, 3)).reshape(H, L)

    kernel = functools.partial(_rcnn_rk4_kernel, W=W, dx=dx, dt=dt, n_steps=n_steps)
    out = pl.pallas_call(
        kernel,
        out_shape=jax.ShapeDtypeStruct((H, L), jnp.float32),
        in_specs=[
            pl.BlockSpec(memory_space=pltpu.MemorySpace.SMEM),   # [nu, UA, UB, VA, VB]
            pl.BlockSpec(memory_space=pltpu.MemorySpace.VMEM),   # state slab (H, 2BW)
            pl.BlockSpec(memory_space=pltpu.MemorySpace.VMEM),   # DL (2H, H)
            pl.BlockSpec(memory_space=pltpu.MemorySpace.VMEM),   # wcol (1, 2BW)
        ],
        out_specs=pl.BlockSpec(memory_space=pltpu.MemorySpace.VMEM),
    )(params, x, DL, wcol)

    # Back to the PyTorch NCHW convention.
    return jnp.transpose(out.reshape(H, 2, B, W), (2, 1, 0, 3))


# ----------------------------------------------------------------------------
# Pure-JAX reference (mirrors torch padMethod + conv semantics via rolls)
# ----------------------------------------------------------------------------
def _ref_forward(h, Re, UA, UB, VA, VB, dt, dx, mu_up):
    def dH(a):
        r = lambda s: jnp.roll(a, s, axis=-2)
        return (r(2) - 8.0 * r(1) + 8.0 * r(-1) - r(-2)) / (12.0 * dx)

    def dW(a):
        r = lambda s: jnp.roll(a, s, axis=-1)
        return (r(2) - 8.0 * r(1) + 8.0 * r(-1) - r(-2)) / (12.0 * dx)

    def lap(a):
        rh = lambda s: jnp.roll(a, s, axis=-2)
        rw = lambda s: jnp.roll(a, s, axis=-1)
        return ((-1.0 / 12) * (rh(2) + rh(-2) + rw(2) + rw(-2))
                + (4.0 / 3) * (rh(1) + rh(-1) + rw(1) + rw(-1))
                - 5.0 * a) / dx ** 2

    nu = mu_up * (1.0 / Re)

    def f_rhs(u, v):
        f_u = nu * lap(u) + UA * u * dH(u) + UB * v * dW(u)
        f_v = nu * lap(v) + VA * u * dH(v) + VB * v * dW(v)
        return f_u, f_v

    u0, v0 = h[:, 0], h[:, 1]
    k1u, k1v = f_rhs(u0, v0)
    u1, v1 = u0 + k1u * dt / 2.0, v0 + k1v * dt / 2.0
    k2u, k2v = f_rhs(u1, v1)
    u2, v2 = u0 + k2u * dt / 2.0, v0 + k2v * dt / 2.0
    k3u, k3v = f_rhs(u2, v2)
    u3, v3 = u0 + k3u * dt, v0 + k3v * dt
    k4u, k4v = f_rhs(u3, v3)
    u_next = u0 + dt * (k1u + 2 * k2u + 2 * k3u + k4u) / 6.0
    v_next = v0 + dt * (k1v + 2 * k2v + 2 * k3v + k4v) / 6.0
    return jnp.stack([u_next, v_next], axis=1)


if __name__ == "__main__":
    B, H, W = 2, 32, 32
    key = jax.random.PRNGKey(0)
    h = 0.01 * jax.random.normal(key, (B, 2, H, W), dtype=jnp.float32)

    # Deterministic "parameters" (module __init__ draws 5 scalars)
    rng = np.random.RandomState(0)
    Re, UA, UB, VA, VB = (float(rng.rand()) for _ in range(5))
    nu = MU_UP * (1.0 / Re)
    params = jnp.array([nu, UA, UB, VA, VB], dtype=jnp.float32)

    DL = make_h_operator(H, DX)
    wcol = make_wcol(B, W)

    # --- single RK4 step: matches the torch module's forward() --------------
    out = rcnn_cell_forward(h, params, DL, wcol)
    out = jax.block_until_ready(out)

    ref = _ref_forward(h, Re, UA, UB, VA, VB, DT, DX, MU_UP)
    ref = jax.block_until_ready(ref)

    assert out.shape == (B, 2, H, W)
    assert np.isfinite(np.asarray(out)).all()
    rel = float(jnp.max(jnp.abs(out - ref)) / (jnp.max(jnp.abs(ref)) + 1e-12))
    assert rel < 2e-2, f"kernel/reference mismatch, rel err = {rel}"

    # --- fused multi-step rollout path (launch-overhead amortization) -------
    # Small dt so the explicit RK4 rollout stays bounded for this demo.
    dt_s = 1e-3
    fused = rcnn_cell_forward(h, params, DL, wcol, dt=dt_s, n_steps=4)
    seq = h
    for _ in range(4):
        seq = rcnn_cell_forward(seq, params, DL, wcol, dt=dt_s, n_steps=1)
    fused, seq = jax.block_until_ready((fused, seq))
    assert np.isfinite(np.asarray(fused)).all()
    rel2 = float(jnp.max(jnp.abs(fused - seq)) / (jnp.max(jnp.abs(seq)) + 1e-12))
    assert rel2 < 1e-3, f"fused rollout mismatch, rel err = {rel2}"

    print("KERNEL_OK")
</pallas_src>

<mosaic_0001>
module attributes {stable_mosaic.version = 11 : i64} {
  func.func @_rcnn_rk4_kernel(%arg0: memref<5xf32, #tpu.memory_space<smem>>, %arg1: memref<32x128xf32, #tpu.memory_space<vmem>>, %arg2: memref<64x32xf32, #tpu.memory_space<vmem>>, %arg3: memref<1x128xi32, #tpu.memory_space<vmem>>, %arg4: memref<32x128xf32, #tpu.memory_space<vmem>>) attributes {dimension_semantics = [], scalar_prefetch = 0 : i64, scratch_operands = 0 : i64, tpu.core_type = #tpu.core_type<tc>} {
    %c0 = arith.constant 0 : index
    %0 = memref.load %arg0[%c0] : memref<5xf32, #tpu.memory_space<smem>>
    %c1 = arith.constant 1 : index
    %1 = memref.load %arg0[%c1] : memref<5xf32, #tpu.memory_space<smem>>
    %c2 = arith.constant 2 : index
    %2 = memref.load %arg0[%c2] : memref<5xf32, #tpu.memory_space<smem>>
    %c3 = arith.constant 3 : index
    %3 = memref.load %arg0[%c3] : memref<5xf32, #tpu.memory_space<smem>>
    %c4 = arith.constant 4 : index
    %4 = memref.load %arg0[%c4] : memref<5xf32, #tpu.memory_space<smem>>
    %c0_0 = arith.constant 0 : index
    %c0_1 = arith.constant 0 : index
    %5 = vector.load %arg2[%c0_0, %c0_1] : memref<64x32xf32, #tpu.memory_space<vmem>>, vector<64x32xf32>
    %c0_2 = arith.constant 0 : index
    %c0_3 = arith.constant 0 : index
    %6 = vector.load %arg3[%c0_2, %c0_3] : memref<1x128xi32, #tpu.memory_space<vmem>>, vector<1x128xi32>
    %7 = vector.shape_cast %6 : vector<1x128xi32> to vector<1x128xi32>
    %8 = vector.broadcast %7 : vector<1x128xi32> to vector<32x128xi32>
    %9 = tpu.iota {dimensions = array<i32: 1>} : vector<32x128xi32>
    %c64_i32 = arith.constant 64 : i32
    %10 = vector.broadcast %c64_i32 : i32 to vector<32x128xi32>
    %11 = arith.cmpi slt, %9, %10 : vector<32x128xi32>
    %c1_i32 = arith.constant 1 : i32
    %12 = vector.broadcast %c1_i32 : i32 to vector<32x128xi32>
    %13 = arith.cmpi slt, %8, %12 : vector<32x128xi32>
    %c2_i32 = arith.constant 2 : i32
    %14 = vector.broadcast %c2_i32 : i32 to vector<32x128xi32>
    %15 = arith.cmpi slt, %8, %14 : vector<32x128xi32>
    %c31_i32 = arith.constant 31 : i32
    %16 = vector.broadcast %c31_i32 : i32 to vector<32x128xi32>
    %17 = arith.cmpi sge, %8, %16 : vector<32x128xi32>
    %c30_i32 = arith.constant 30 : i32
    %18 = vector.broadcast %c30_i32 : i32 to vector<32x128xi32>
    %19 = arith.cmpi sge, %8, %18 : vector<32x128xi32>
    %20 = vector.broadcast %1 : f32 to vector<32x128xf32>
    %21 = vector.broadcast %3 : f32 to vector<32x128xf32>
    %22 = arith.select %11, %20, %21 : vector<32x128xi1>, vector<32x128xf32>
    %23 = vector.broadcast %2 : f32 to vector<32x128xf32>
    %24 = vector.broadcast %4 : f32 to vector<32x128xf32>
    %25 = arith.select %11, %23, %24 : vector<32x128xi1>, vector<32x128xf32>
    %c0_4 = arith.constant 0 : index
    %c0_5 = arith.constant 0 : index
    %26 = vector.load %arg1[%c0_4, %c0_5] : memref<32x128xf32, #tpu.memory_space<vmem>>, vector<32x128xf32>
    %cst = arith.constant dense<0.000000e+00> : vector<64x128xf32>
    %27 = tpu.matmul %5, %26, %cst {dimension_numbers = #tpu.dot_dimension_numbers<[1], [0], [0], [1], [0, 0, 1, 1], [], []>, precision = #tpu.contract_precision<fp32>} : vector<64x32xf32>, vector<32x128xf32>, vector<64x128xf32> -> vector<64x128xf32>
    %28 = vector.extract_strided_slice %27 {offsets = [0, 0], sizes = [32, 128], strides = [1, 1]} : vector<64x128xf32> to vector<32x128xf32>
    %29 = vector.extract_strided_slice %27 {offsets = [32, 0], sizes = [32, 128], strides = [1, 1]} : vector<64x128xf32> to vector<32x128xf32>
    %c1_i32_6 = arith.constant 1 : i32
    %30 = tpu.dynamic_rotate %26 by %c1_i32_6 dim 1 : vector<32x128xf32>, i32 -> vector<32x128xf32>
    %c97_i32 = arith.constant 97 : i32
    %31 = tpu.dynamic_rotate %26 by %c97_i32 dim 1 : vector<32x128xf32>, i32 -> vector<32x128xf32>
    %32 = arith.select %13, %31, %30 : vector<32x128xi1>, vector<32x128xf32>
    %c2_i32_7 = arith.constant 2 : i32
    %33 = tpu.dynamic_rotate %26 by %c2_i32_7 dim 1 : vector<32x128xf32>, i32 -> vector<32x128xf32>
    %c98_i32 = arith.constant 98 : i32
    %34 = tpu.dynamic_rotate %26 by %c98_i32 dim 1 : vector<32x128xf32>, i32 -> vector<32x128xf32>
    %35 = arith.select %15, %34, %33 : vector<32x128xi1>, vector<32x128xf32>
    %c127_i32 = arith.constant 127 : i32
    %36 = tpu.dynamic_rotate %26 by %c127_i32 dim 1 : vector<32x128xf32>, i32 -> vector<32x128xf32>
    %c31_i32_8 = arith.constant 31 : i32
    %37 = tpu.dynamic_rotate %26 by %c31_i32_8 dim 1 : vector<32x128xf32>, i32 -> vector<32x128xf32>
    %38 = arith.select %17, %37, %36 : vector<32x128xi1>, vector<32x128xf32>
    %c126_i32 = arith.constant 126 : i32
    %39 = tpu.dynamic_rotate %26 by %c126_i32 dim 1 : vector<32x128xf32>, i32 -> vector<32x128xf32>
    %c30_i32_9 = arith.constant 30 : i32
    %40 = tpu.dynamic_rotate %26 by %c30_i32_9 dim 1 : vector<32x128xf32>, i32 -> vector<32x128xf32>
    %41 = arith.select %19, %40, %39 : vector<32x128xi1>, vector<32x128xf32>
    %cst_10 = arith.constant 8.000000e+00 : f32
    %42 = vector.broadcast %cst_10 : f32 to vector<32x128xf32>
    %43 = arith.mulf %42, %32 : vector<32x128xf32>
    %44 = arith.subf %35, %43 : vector<32x128xf32>
    %cst_11 = arith.constant 8.000000e+00 : f32
    %45 = vector.broadcast %cst_11 : f32 to vector<32x128xf32>
    %46 = arith.mulf %45, %38 : vector<32x128xf32>
    %47 = arith.addf %44, %46 : vector<32x128xf32>
    %48 = arith.subf %47, %41 : vector<32x128xf32>
    %cst_12 = arith.constant 8.33333301 : f32
    %49 = vector.broadcast %cst_12 : f32 to vector<32x128xf32>
    %50 = arith.mulf %48, %49 : vector<32x128xf32>
    %51 = arith.addf %35, %41 : vector<32x128xf32>
    %cst_13 = arith.constant -0.0833333358 : f32
    %52 = vector.broadcast %cst_13 : f32 to vector<32x128xf32>
    %53 = arith.mulf %52, %51 : vector<32x128xf32>
    %54 = arith.addf %32, %38 : vector<32x128xf32>
    %cst_14 = arith.constant 1.33333337 : f32
    %55 = vector.broadcast %cst_14 : f32 to vector<32x128xf32>
    %56 = arith.mulf %55, %54 : vector<32x128xf32>
    %57 = arith.addf %53, %56 : vector<32x128xf32>
    %cst_15 = arith.constant 2.500000e+00 : f32
    %58 = vector.broadcast %cst_15 : f32 to vector<32x128xf32>
    %59 = arith.mulf %58, %26 : vector<32x128xf32>
    %60 = arith.subf %57, %59 : vector<32x128xf32>
    %cst_16 = arith.constant 1.000000e+04 : f32
    %61 = vector.broadcast %cst_16 : f32 to vector<32x128xf32>
    %62 = arith.mulf %60, %61 : vector<32x128xf32>
    %63 = arith.addf %29, %62 : vector<32x128xf32>
    %c64_i32_17 = arith.constant 64 : i32
    %64 = tpu.dynamic_rotate %26 by %c64_i32_17 dim 1 : vector<32x128xf32>, i32 -> vector<32x128xf32>
    %65 = arith.select %11, %26, %64 : vector<32x128xi1>, vector<32x128xf32>
    %66 = arith.select %11, %64, %26 : vector<32x128xi1>, vector<32x128xf32>
    %67 = vector.broadcast %0 : f32 to vector<32x128xf32>
    %68 = arith.mulf %67, %63 : vector<32x128xf32>
    %69 = arith.mulf %22, %65 : vector<32x128xf32>
    %70 = arith.mulf %69, %28 : vector<32x128xf32>
    %71 = arith.addf %68, %70 : vector<32x128xf32>
    %72 = arith.mulf %25, %66 : vector<32x128xf32>
    %73 = arith.mulf %72, %50 : vector<32x128xf32>
    %74 = arith.addf %71, %73 : vector<32x128xf32>
    %cst_18 = arith.constant 2.500000e-01 : f32
    %75 = vector.broadcast %cst_18 : f32 to vector<32x128xf32>
    %76 = arith.mulf %75, %74 : vector<32x128xf32>
    %77 = arith.addf %26, %76 : vector<32x128xf32>
    %cst_19 = arith.constant dense<0.000000e+00> : vector<64x128xf32>
    %78 = tpu.matmul %5, %77, %cst_19 {dimension_numbers = #tpu.dot_dimension_numbers<[1], [0], [0], [1], [0, 0, 1, 1], [], []>, precision = #tpu.contract_precision<fp32>} : vector<64x32xf32>, vector<32x128xf32>, vector<64x128xf32> -> vector<64x128xf32>
    %79 = vector.extract_strided_slice %78 {offsets = [0, 0], sizes = [32, 128], strides = [1, 1]} : vector<64x128xf32> to vector<32x128xf32>
    %80 = vector.extract_strided_slice %78 {offsets = [32, 0], sizes = [32, 128], strides = [1, 1]} : vector<64x128xf32> to vector<32x128xf32>
    %c1_i32_20 = arith.constant 1 : i32
    %81 = tpu.dynamic_rotate %77 by %c1_i32_20 dim 1 : vector<32x128xf32>, i32 -> vector<32x128xf32>
    %c97_i32_21 = arith.constant 97 : i32
    %82 = tpu.dynamic_rotate %77 by %c97_i32_21 dim 1 : vector<32x128xf32>, i32 -> vector<32x128xf32>
    %83 = arith.select %13, %82, %81 : vector<32x128xi1>, vector<32x128xf32>
    %c2_i32_22 = arith.constant 2 : i32
    %84 = tpu.dynamic_rotate %77 by %c2_i32_22 dim 1 : vector<32x128xf32>, i32 -> vector<32x128xf32>
    %c98_i32_23 = arith.constant 98 : i32
    %85 = tpu.dynamic_rotate %77 by %c98_i32_23 dim 1 : vector<32x128xf32>, i32 -> vector<32x128xf32>
    %86 = arith.select %15, %85, %84 : vector<32x128xi1>, vector<32x128xf32>
    %c127_i32_24 = arith.constant 127 : i32
    %87 = tpu.dynamic_rotate %77 by %c127_i32_24 dim 1 : vector<32x128xf32>, i32 -> vector<32x128xf32>
    %c31_i32_25 = arith.constant 31 : i32
    %88 = tpu.dynamic_rotate %77 by %c31_i32_25 dim 1 : vector<32x128xf32>, i32 -> vector<32x128xf32>
    %89 = arith.select %17, %88, %87 : vector<32x128xi1>, vector<32x128xf32>
    %c126_i32_26 = arith.constant 126 : i32
    %90 = tpu.dynamic_rotate %77 by %c126_i32_26 dim 1 : vector<32x128xf32>, i32 -> vector<32x128xf32>
    %c30_i32_27 = arith.constant 30 : i32
    %91 = tpu.dynamic_rotate %77 by %c30_i32_27 dim 1 : vector<32x128xf32>, i32 -> vector<32x128xf32>
    %92 = arith.select %19, %91, %90 : vector<32x128xi1>, vector<32x128xf32>
    %cst_28 = arith.constant 8.000000e+00 : f32
    %93 = vector.broadcast %cst_28 : f32 to vector<32x128xf32>
    %94 = arith.mulf %93, %83 : vector<32x128xf32>
    %95 = arith.subf %86, %94 : vector<32x128xf32>
    %cst_29 = arith.constant 8.000000e+00 : f32
    %96 = vector.broadcast %cst_29 : f32 to vector<32x128xf32>
    %97 = arith.mulf %96, %89 : vector<32x128xf32>
    %98 = arith.addf %95, %97 : vector<32x128xf32>
    %99 = arith.subf %98, %92 : vector<32x128xf32>
    %cst_30 = arith.constant 8.33333301 : f32
    %100 = vector.broadcast %cst_30 : f32 to vector<32x128xf32>
    %101 = arith.mulf %99, %100 : vector<32x128xf32>
    %102 = arith.addf %86, %92 : vector<32x128xf32>
    %cst_31 = arith.constant -0.0833333358 : f32
    %103 = vector.broadcast %cst_31 : f32 to vector<32x128xf32>
    %104 = arith.mulf %103, %102 : vector<32x128xf32>
    %105 = arith.addf %83, %89 : vector<32x128xf32>
    %cst_32 = arith.constant 1.33333337 : f32
    %106 = vector.broadcast %cst_32 : f32 to vector<32x128xf32>
    %107 = arith.mulf %106, %105 : vector<32x128xf32>
    %108 = arith.addf %104, %107 : vector<32x128xf32>
    %cst_33 = arith.constant 2.500000e+00 : f32
    %109 = vector.broadcast %cst_33 : f32 to vector<32x128xf32>
    %110 = arith.mulf %109, %77 : vector<32x128xf32>
    %111 = arith.subf %108, %110 : vector<32x128xf32>
    %cst_34 = arith.constant 1.000000e+04 : f32
    %112 = vector.broadcast %cst_34 : f32 to vector<32x128xf32>
    %113 = arith.mulf %111, %112 : vector<32x128xf32>
    %114 = arith.addf %80, %113 : vector<32x128xf32>
    %c64_i32_35 = arith.constant 64 : i32
    %115 = tpu.dynamic_rotate %77 by %c64_i32_35 dim 1 : vector<32x128xf32>, i32 -> vector<32x128xf32>
    %116 = arith.select %11, %77, %115 : vector<32x128xi1>, vector<32x128xf32>
    %117 = arith.select %11, %115, %77 : vector<32x128xi1>, vector<32x128xf32>
    %118 = vector.broadcast %0 : f32 to vector<32x128xf32>
    %119 = arith.mulf %118, %114 : vector<32x128xf32>
    %120 = arith.mulf %22, %116 : vector<32x128xf32>
    %121 = arith.mulf %120, %79 : vector<32x128xf32>
    %122 = arith.addf %119, %121 : vector<32x128xf32>
    %123 = arith.mulf %25, %117 : vector<32x128xf32>
    %124 = arith.mulf %123, %101 : vector<32x128xf32>
    %125 = arith.addf %122, %124 : vector<32x128xf32>
    %cst_36 = arith.constant 2.500000e-01 : f32
    %126 = vector.broadcast %cst_36 : f32 to vector<32x128xf32>
    %127 = arith.mulf %126, %125 : vector<32x128xf32>
    %128 = arith.addf %26, %127 : vector<32x128xf32>
    %cst_37 = arith.constant dense<0.000000e+00> : vector<64x128xf32>
    %129 = tpu.matmul %5, %128, %cst_37 {dimension_numbers = #tpu.dot_dimension_numbers<[1], [0], [0], [1], [0, 0, 1, 1], [], []>, precision = #tpu.contract_precision<fp32>} : vector<64x32xf32>, vector<32x128xf32>, vector<64x128xf32> -> vector<64x128xf32>
    %130 = vector.extract_strided_slice %129 {offsets = [0, 0], sizes = [32, 128], strides = [1, 1]} : vector<64x128xf32> to vector<32x128xf32>
    %131 = vector.extract_strided_slice %129 {offsets = [32, 0], sizes = [32, 128], strides = [1, 1]} : vector<64x128xf32> to vector<32x128xf32>
    %c1_i32_38 = arith.constant 1 : i32
    %132 = tpu.dynamic_rotate %128 by %c1_i32_38 dim 1 : vector<32x128xf32>, i32 -> vector<32x128xf32>
    %c97_i32_39 = arith.constant 97 : i32
    %133 = tpu.dynamic_rotate %128 by %c97_i32_39 dim 1 : vector<32x128xf32>, i32 -> vector<32x128xf32>
    %134 = arith.select %13, %133, %132 : vector<32x128xi1>, vector<32x128xf32>
    %c2_i32_40 = arith.constant 2 : i32
    %135 = tpu.dynamic_rotate %128 by %c2_i32_40 dim 1 : vector<32x128xf32>, i32 -> vector<32x128xf32>
    %c98_i32_41 = arith.constant 98 : i32
    %136 = tpu.dynamic_rotate %128 by %c98_i32_41 dim 1 : vector<32x128xf32>, i32 -> vector<32x128xf32>
    %137 = arith.select %15, %136, %135 : vector<32x128xi1>, vector<32x128xf32>
    %c127_i32_42 = arith.constant 127 : i32
    %138 = tpu.dynamic_rotate %128 by %c127_i32_42 dim 1 : vector<32x128xf32>, i32 -> vector<32x128xf32>
    %c31_i32_43 = arith.constant 31 : i32
    %139 = tpu.dynamic_rotate %128 by %c31_i32_43 dim 1 : vector<32x128xf32>, i32 -> vector<32x128xf32>
    %140 = arith.select %17, %139, %138 : vector<32x128xi1>, vector<32x128xf32>
    %c126_i32_44 = arith.constant 126 : i32
    %141 = tpu.dynamic_rotate %128 by %c126_i32_44 dim 1 : vector<32x128xf32>, i32 -> vector<32x128xf32>
    %c30_i32_45 = arith.constant 30 : i32
    %142 = tpu.dynamic_rotate %128 by %c30_i32_45 dim 1 : vector<32x128xf32>, i32 -> vector<32x128xf32>
    %143 = arith.select %19, %142, %141 : vector<32x128xi1>, vector<32x128xf32>
    %cst_46 = arith.constant 8.000000e+00 : f32
    %144 = vector.broadcast %cst_46 : f32 to vector<32x128xf32>
    %145 = arith.mulf %144, %134 : vector<32x128xf32>
    %146 = arith.subf %137, %145 : vector<32x128xf32>
    %cst_47 = arith.constant 8.000000e+00 : f32
    %147 = vector.broadcast %cst_47 : f32 to vector<32x128xf32>
    %148 = arith.mulf %147, %140 : vector<32x128xf32>
    %149 = arith.addf %146, %148 : vector<32x128xf32>
    %150 = arith.subf %149, %143 : vector<32x128xf32>
    %cst_48 = arith.constant 8.33333301 : f32
    %151 = vector.broadcast %cst_48 : f32 to vector<32x128xf32>
    %152 = arith.mulf %150, %151 : vector<32x128xf32>
    %153 = arith.addf %137, %143 : vector<32x128xf32>
    %cst_49 = arith.constant -0.0833333358 : f32
    %154 = vector.broadcast %cst_49 : f32 to vector<32x128xf32>
    %155 = arith.mulf %154, %153 : vector<32x128xf32>
    %156 = arith.addf %134, %140 : vector<32x128xf32>
    %cst_50 = arith.constant 1.33333337 : f32
    %157 = vector.broadcast %cst_50 : f32 to vector<32x128xf32>
    %158 = arith.mulf %157, %156 : vector<32x128xf32>
    %159 = arith.addf %155, %158 : vector<32x128xf32>
    %cst_51 = arith.constant 2.500000e+00 : f32
    %160 = vector.broadcast %cst_51 : f32 to vector<32x128xf32>
    %161 = arith.mulf %160, %128 : vector<32x128xf32>
    %162 = arith.subf %159, %161 : vector<32x128xf32>
    %cst_52 = arith.constant 1.000000e+04 : f32
    %163 = vector.broadcast %cst_52 : f32 to vector<32x128xf32>
    %164 = arith.mulf %162, %163 : vector<32x128xf32>
    %165 = arith.addf %131, %164 : vector<32x128xf32>
    %c64_i32_53 = arith.constant 64 : i32
    %166 = tpu.dynamic_rotate %128 by %c64_i32_53 dim 1 : vector<32x128xf32>, i32 -> vector<32x128xf32>
    %167 = arith.select %11, %128, %166 : vector<32x128xi1>, vector<32x128xf32>
    %168 = arith.select %11, %166, %128 : vector<32x128xi1>, vector<32x128xf32>
    %169 = vector.broadcast %0 : f32 to vector<32x128xf32>
    %170 = arith.mulf %169, %165 : vector<32x128xf32>
    %171 = arith.mulf %22, %167 : vector<32x128xf32>
    %172 = arith.mulf %171, %130 : vector<32x128xf32>
    %173 = arith.addf %170, %172 : vector<32x128xf32>
    %174 = arith.mulf %25, %168 : vector<32x128xf32>
    %175 = arith.mulf %174, %152 : vector<32x128xf32>
    %176 = arith.addf %173, %175 : vector<32x128xf32>
    %cst_54 = arith.constant 5.000000e-01 : f32
    %177 = vector.broadcast %cst_54 : f32 to vector<32x128xf32>
    %178 = arith.mulf %177, %176 : vector<32x128xf32>
    %179 = arith.addf %26, %178 : vector<32x128xf32>
    %cst_55 = arith.constant dense<0.000000e+00> : vector<64x128xf32>
    %180 = tpu.matmul %5, %179, %cst_55 {dimension_numbers = #tpu.dot_dimension_numbers<[1], [0], [0], [1], [0, 0, 1, 1], [], []>, precision = #tpu.contract_precision<fp32>} : vector<64x32xf32>, vector<32x128xf32>, vector<64x128xf32> -> vector<64x128xf32>
    %181 = vector.extract_strided_slice %180 {offsets = [0, 0], sizes = [32, 128], strides = [1, 1]} : vector<64x128xf32> to vector<32x128xf32>
    %182 = vector.extract_strided_slice %180 {offsets = [32, 0], sizes = [32, 128], strides = [1, 1]} : vector<64x128xf32> to vector<32x128xf32>
    %c1_i32_56 = arith.constant 1 : i32
    %183 = tpu.dynamic_rotate %179 by %c1_i32_56 dim 1 : vector<32x128xf32>, i32 -> vector<32x128xf32>
    %c97_i32_57 = arith.constant 97 : i32
    %184 = tpu.dynamic_rotate %179 by %c97_i32_57 dim 1 : vector<32x128xf32>, i32 -> vector<32x128xf32>
    %185 = arith.select %13, %184, %183 : vector<32x128xi1>, vector<32x128xf32>
    %c2_i32_58 = arith.constant 2 : i32
    %186 = tpu.dynamic_rotate %179 by %c2_i32_58 dim 1 : vector<32x128xf32>, i32 -> vector<32x128xf32>
    %c98_i32_59 = arith.constant 98 : i32
    %187 = tpu.dynamic_rotate %179 by %c98_i32_59 dim 1 : vector<32x128xf32>, i32 -> vector<32x128xf32>
    %188 = arith.select %15, %187, %186 : vector<32x128xi1>, vector<32x128xf32>
    %c127_i32_60 = arith.constant 127 : i32
    %189 = tpu.dynamic_rotate %179 by %c127_i32_60 dim 1 : vector<32x128xf32>, i32 -> vector<32x128xf32>
    %c31_i32_61 = arith.constant 31 : i32
    %190 = tpu.dynamic_rotate %179 by %c31_i32_61 dim 1 : vector<32x128xf32>, i32 -> vector<32x128xf32>
    %191 = arith.select %17, %190, %189 : vector<32x128xi1>, vector<32x128xf32>
    %c126_i32_62 = arith.constant 126 : i32
    %192 = tpu.dynamic_rotate %179 by %c126_i32_62 dim 1 : vector<32x128xf32>, i32 -> vector<32x128xf32>
    %c30_i32_63 = arith.constant 30 : i32
    %193 = tpu.dynamic_rotate %179 by %c30_i32_63 dim 1 : vector<32x128xf32>, i32 -> vector<32x128xf32>
    %194 = arith.select %19, %193, %192 : vector<32x128xi1>, vector<32x128xf32>
    %cst_64 = arith.constant 8.000000e+00 : f32
    %195 = vector.broadcast %cst_64 : f32 to vector<32x128xf32>
    %196 = arith.mulf %195, %185 : vector<32x128xf32>
    %197 = arith.subf %188, %196 : vector<32x128xf32>
    %cst_65 = arith.constant 8.000000e+00 : f32
    %198 = vector.broadcast %cst_65 : f32 to vector<32x128xf32>
    %199 = arith.mulf %198, %191 : vector<32x128xf32>
    %200 = arith.addf %197, %199 : vector<32x128xf32>
    %201 = arith.subf %200, %194 : vector<32x128xf32>
    %cst_66 = arith.constant 8.33333301 : f32
    %202 = vector.broadcast %cst_66 : f32 to vector<32x128xf32>
    %203 = arith.mulf %201, %202 : vector<32x128xf32>
    %204 = arith.addf %188, %194 : vector<32x128xf32>
    %cst_67 = arith.constant -0.0833333358 : f32
    %205 = vector.broadcast %cst_67 : f32 to vector<32x128xf32>
    %206 = arith.mulf %205, %204 : vector<32x128xf32>
    %207 = arith.addf %185, %191 : vector<32x128xf32>
    %cst_68 = arith.constant 1.33333337 : f32
    %208 = vector.broadcast %cst_68 : f32 to vector<32x128xf32>
    %209 = arith.mulf %208, %207 : vector<32x128xf32>
    %210 = arith.addf %206, %209 : vector<32x128xf32>
    %cst_69 = arith.constant 2.500000e+00 : f32
    %211 = vector.broadcast %cst_69 : f32 to vector<32x128xf32>
    %212 = arith.mulf %211, %179 : vector<32x128xf32>
    %213 = arith.subf %210, %212 : vector<32x128xf32>
    %cst_70 = arith.constant 1.000000e+04 : f32
    %214 = vector.broadcast %cst_70 : f32 to vector<32x128xf32>
    %215 = arith.mulf %213, %214 : vector<32x128xf32>
    %216 = arith.addf %182, %215 : vector<32x128xf32>
    %c64_i32_71 = arith.constant 64 : i32
    %217 = tpu.dynamic_rotate %179 by %c64_i32_71 dim 1 : vector<32x128xf32>, i32 -> vector<32x128xf32>
    %218 = arith.select %11, %179, %217 : vector<32x128xi1>, vector<32x128xf32>
    %219 = arith.select %11, %217, %179 : vector<32x128xi1>, vector<32x128xf32>
    %220 = vector.broadcast %0 : f32 to vector<32x128xf32>
    %221 = arith.mulf %220, %216 : vector<32x128xf32>
    %222 = arith.mulf %22, %218 : vector<32x128xf32>
    %223 = arith.mulf %222, %181 : vector<32x128xf32>
    %224 = arith.addf %221, %223 : vector<32x128xf32>
    %225 = arith.mulf %25, %219 : vector<32x128xf32>
    %226 = arith.mulf %225, %203 : vector<32x128xf32>
    %227 = arith.addf %224, %226 : vector<32x128xf32>
    %228 = arith.addf %125, %176 : vector<32x128xf32>
    %cst_72 = arith.constant 2.000000e+00 : f32
    %229 = vector.broadcast %cst_72 : f32 to vector<32x128xf32>
    %230 = arith.mulf %229, %228 : vector<32x128xf32>
    %231 = arith.addf %74, %230 : vector<32x128xf32>
    %232 = arith.addf %231, %227 : vector<32x128xf32>
    %cst_73 = arith.constant 0.0833333358 : f32
    %233 = vector.broadcast %cst_73 : f32 to vector<32x128xf32>
    %234 = arith.mulf %233, %232 : vector<32x128xf32>
    %235 = arith.addf %26, %234 : vector<32x128xf32>
    %c0_74 = arith.constant 0 : index
    %c0_75 = arith.constant 0 : index
    %236 = vector.load %arg4[%c0_74, %c0_75] : memref<32x128xf32, #tpu.memory_space<vmem>>, vector<32x128xf32>
    tpu.vector_store %arg4[%c0_74, %c0_75], %235 {strides = array<i32>} : memref<32x128xf32, #tpu.memory_space<vmem>>, vector<32x128xf32>,
    return
  }
}

</mosaic_0001>

<bundles_post_ra>
// kernel: rcnn_cell_forward.1
= control target key start
LH: loop header
LB: loop body
LE: loop exit
PB: predicated region body
PF: predicated region fallthrough
CT: control target
= control target key end

     0   :  { %9 = vsyncpa [#allocation3], 0  ;;  %s6627_s0 = inlined_call_operand.vmem [shape: f32[5], index: 0, kind: input, shape index: {}]   ;;  %s6628_s1 = inlined_call_operand.vmem [shape: f32[32,128], index: 1, kind: input, shape index: {}]   ;;  %s6629_s2 = inlined_call_operand.vmem [shape: f32[64,32], index: 2, kind: input, shape index: {}]   ;;  %s6630_s3 = inlined_call_operand.vmem [shape: s32[1,128], index: 3, kind: input, shape index: {}]   ;;  %s6631_s4 = inlined_call_operand.vmem [shape: f32[32,128], index: 4, kind: output, shape index: {}]  }
   0x1   :  { %s16_s17 = sshll.u32 %s6627_s0, 4  ;;  %s17_s17 = int_to_ptr.vmem [resolvable:$true] %s16_s17 }
   0x2   :  { %s5171_s18 = scalar_lea.vmem %s17_s17, 16  ;;  %p5176_p1 = scmp.lt.s32.totalorder %s17_s17, %s17_s17 }
   0x3   :  { %p5172_p0 = scmp.ne.s32.totalorder %s17_s17, %s5171_s18  ;;  %p5177_p2 = scmp.lt.s32.totalorder %s5171_s18, %s5171_s18 }
   0x5   :  { %p5178_p3 = por %p5177_p2, %p5176_p1 }
   0x7   :  { %p5179_p4 = pnand %p5178_p3, %p5172_p0 }
   0x9   :  { %5182 = shalt.err (!%p5179_p4)
}
   0xa   :  { %s5185_s19 = smov [#allocation2]  }
   0xb   :  { %19 = dma.vmem_to_smem %s17_s17, 16, %s5185_s19, [#allocation3]  }
   0xc   :  { %5183 = dma.done.wait [#allocation3], 16  }
   0xd   :  { %5184 = vsyncadd [#allocation3], 4294967280 }
   0xe   :  { %29 = sfence }
   0xf   :  { %v5226_v0 = vld [vmem:[%s6628_s1] sm:$0xff]  ;;  %v5231_v1 = vld [vmem:[%s6628_s1 + $0x8] sm:$0xff]  ;;  %v5236_v2 = vld [vmem:[%s6628_s1 + $0x10] sm:$0xff]  ;;  %vm65_vm0 = vcmask 261120   ;;  %s5186_s5 = smov 1   ;;  %s5187_s12 = smov 97  }
  0x10   :  { %v91_v3 = vand.u32 4294901760, %v5226_v0  ;;  %v94_v4 = vand.u32 4294901760, %v5231_v1  ;;  %v5243_v5 = vld [vmem:[%s6628_s1 + $0x18] sm:$0xff]  ;;  %v97_v6 = vand.u32 4294901760, %v5236_v2  ;;  %v35_v7 = vld [vmem:[%s6629_s2] sm:$0xff]  ;;  %v36_v8 = vld [vmem:[%s6629_s2 + $0x8] sm:$0xff]  ;;  %876 = vrot.lane.b32.xlu0 %v5226_v0, %s5186_s5 }
  0x11   :  { %v100_v9 = vand.u32 4294901760, %v5243_v5  ;;  %v67_v10 = vsel %vm65_vm0, %v35_v7, 0  ;;  %v70_v11 = vsel %vm65_vm0, %v36_v8, 0  ;;  %v37_v12 = vld [vmem:[%s6629_s2 + $0x10] sm:$0xff]  ;;  %v38_v13 = vld [vmem:[%s6629_s2 + $0x18] sm:$0xff]  ;;  %v39_v14 = vld [vmem:[%s6629_s2 + $0x20] sm:$0xff]  ;;  %884 = vrot.lane.b32.xlu1 %v5226_v0, %s5187_s12 }
  0x12   :  { %v5268_v15 = vpack.c.bf16 %v94_v4, %v91_v3  ;;  %v5270_v16 = vand.u32 4294901760, %v67_v10  ;;  %v5272_v17 = vand.u32 4294901760, %v70_v11  ;;  %v73_v18 = vsel %vm65_vm0, %v37_v12, 0  ;;  %v40_v19 = vld [vmem:[%s6629_s2 + $0x28] sm:$0xff]  ;;  %s5188_s15 = smov 2   ;;  %v41_v48 = vld [vmem:[%s6629_s2 + $0x30] sm:$0xff] }
  0x13   :  { %v5282_v20 = vpack.c.bf16 %v100_v9, %v97_v6  ;;  %v5284_v21 = vand.u32 4294901760, %v73_v18  ;;  %v76_v22 = vsel %vm65_vm0, %v38_v13, 0  ;;  %v79_v23 = vsel %vm65_vm0, %v39_v14, 0  ;;  %v42_v49 = vld [vmem:[%s6629_s2 + $0x38] sm:$0xff]  ;;  %s5189_s2 = smov 98   ;;  %s5190_s20 = smov 127  }
  0x14   :  { %4802 = vmatprep.subr.bf16.mxu0 %v5268_v15  ;;  %v5290_v24 = vsub.f32 %v67_v10, %v5270_v16  ;;  %v5293_v25 = vsub.f32 %v70_v11, %v5272_v17  ;;  %v5295_v26 = vand.u32 4294901760, %v76_v22  ;;  %v5297_v27 = vand.u32 4294901760, %v79_v23  ;;  %878 = vrot.lane.b32.xlu0 %v5231_v1, %s5186_s5  ;;  %s5191_s21 = smov 31   ;;  %s5192_s22 = smov 126  }
  0x15   :  { %4804 = vmatpush3.bf16.msra.mxu0 %v5268_v15  ;;  %v5303_v28 = vsub.f32 %v73_v18, %v5284_v21  ;;  %v82_v29 = vsel %vm65_vm0, %v40_v19, 0  ;;  %v5307_v30 = vsub.f32 %v5226_v0, %v91_v3  ;;  %v5310_v31 = vsub.f32 %v5231_v1, %v94_v4  ;;  %886 = vrot.lane.b32.xlu1 %v5231_v1, %s5187_s12  ;;  %s5193_s0 = smov 30   ;;  %s5194_s23 = smov 64  }
  0x16   :  { %6680 = vst [vmem:[#allocation5_spill] sm:$0xff] %v5290_v24  ;;  %6681 = vst [vmem:[#allocation6_spill] sm:$0xff] %v5293_v25  ;;  %4806 = vmatprep.subr.bf16.mxu0 %v5282_v20  ;;  %v5316_v32 = vand.u32 4294901760, %v5290_v24  ;;  %v5319_v33 = vand.u32 4294901760, %v5293_v25  ;;  %v5322_v34 = vsub.f32 %v76_v22, %v5295_v26  ;;  %v5325_v35 = vsub.f32 %v79_v23, %v5297_v27  ;;  %s5608_s26 = sld [smem:[#allocation2 + $0x4]]  ;;  %s5610_s27 = sld [smem:[#allocation2 + $0x1]] }
  0x17   :  { %6682 = vst [vmem:[#allocation7_spill] sm:$0xff] %v5303_v28  ;;  %v5328_v36 = vand.u32 4294901760, %v5303_v28  ;;  %v5330_v37 = vand.u32 4294901760, %v82_v29  ;;  %v242_v38 = vand.u32 4294901760, %v5307_v30  ;;  %v249_v39 = vand.u32 4294901760, %v5310_v31  ;;  %s5616_s28 = sld [smem:[#allocation2 + $0x3]] }
  0x18   :  { %6683 = vst [vmem:[#allocation8_spill] sm:$0xff] %v5316_v32  ;;  %6684 = vst [vmem:[#allocation9_spill] sm:$0xff] %v5319_v33  ;;  %v162_v40 = vsub.f32 %v5290_v24, %v5316_v32  ;;  %v172_v41 = vsub.f32 %v5293_v25, %v5319_v33  ;;  %v5339_v42 = vand.u32 4294901760, %v5322_v34  ;;  %v5342_v43 = vand.u32 4294901760, %v5325_v35  ;;  %896 = vrot.lane.b32.xlu0 %v5226_v0, %s5188_s15  ;;  %s5624_s29 = sld [smem:[#allocation2]] }
  0x19   :  { %6685 = vst [vmem:[#allocation10_spill] sm:$0xff] %v5322_v34  ;;  %6686 = vst [vmem:[#allocation11_spill] sm:$0xff] %v5325_v35  ;;  %4808 = vmatpush3.bf16.msra.mxu0 %v5282_v20  ;;  %v182_v44 = vsub.f32 %v5303_v28, %v5328_v36  ;;  %v5350_v45 = vsub.f32 %v82_v29, %v5330_v37  ;;  %v243_v46 = vsub.f32 %v5307_v30, %v242_v38 }
  0x1a   :  { %6687 = vst [vmem:[#allocation12_spill] sm:$0xff] %v5328_v36  ;;  %6688 = vst [vmem:[#allocation13_spill] sm:$0xff] %v5339_v42  ;;  %v250_v47 = vsub.f32 %v5310_v31, %v249_v39  ;;  %v5364_v50 = vand.u32 4294901760, %v162_v40  ;;  %v5366_v51 = vand.u32 4294901760, %v172_v41  ;;  %v192_v52 = vsub.f32 %v5322_v34, %v5339_v42  ;;  %898 = vrot.lane.b32.xlu1 %v5231_v1, %s5188_s15 }
  0x1b   :  { %6689 = vst [vmem:[#allocation14_spill] sm:$0xff] %v5342_v43  ;;  %6690 = vst [vmem:[#allocation15_spill] sm:$0xff] %v5350_v45  ;;  %v202_v53 = vsub.f32 %v5325_v35, %v5342_v43  ;;  %v5374_v54 = vand.u32 4294901760, %v182_v44  ;;  %v5377_v55 = vand.u32 4294901760, %v5350_v45  ;;  %v244_v56 = vand.u32 4294901760, %v243_v46 }
  0x1c   :  { %6691 = vst [vmem:[#allocation16_spill] sm:$0xff] %v5364_v50  ;;  %v251_v57 = vand.u32 4294901760, %v250_v47  ;;  %4329 = vmatprep.mubr.f32.mxu0 %v5364_v50  ;;  %v5380_v58 = vand.u32 4294901760, %v192_v52  ;;  %v85_v59 = vsel %vm65_vm0, %v41_v48, 0  ;;  %v88_v60 = vsel %vm65_vm0, %v42_v49, 0  ;;  %904 = vrot.lane.b32.xlu0 %v5226_v0, %s5189_s2 }
  0x1d   :  { %6692 = vst [vmem:[#allocation17_spill] sm:$0xff] %v5377_v55  ;;  %4330 = vmatmul.mubr.f32.vlgmr.msra.gmra.mrb[0].mxu0 %v5366_v51  ;;  %v212_v61 = vsub.f32 %v5350_v45, %v5377_v55  ;;  %v5389_v63 = vand.u32 4294901760, %v85_v59  ;;  %v5391_v3 = vand.u32 4294901760, %v88_v60  ;;  %4449 = vmatprep.mubr.f32.mxu1 %v5364_v50  ;;  %v5395_v4 = vand.u32 4294901760, %v202_v53 }
  0x1e   :  { %v4809_v62 = vpack.c.bf16 %v251_v57, %v244_v56  ;;  %4332 = vmatprep.mubr.f32.mxu0 %v5374_v54  ;;  %v5400_v7 = vsub.f32 %v5236_v2, %v97_v6  ;;  %v5405_v8 = vsub.f32 %v5243_v5, %v100_v9  ;;  %906 = vrot.lane.b32.xlu1 %v5231_v1, %s5189_s2 }
  0x1f   :  { %6693 = vst [vmem:[#allocation18_spill] sm:$0xff] %v5389_v63  ;;  %6694 = vst [vmem:[#allocation19_spill] sm:$0xff] %v5391_v3  ;;  %v5408_v10 = vsub.f32 %v85_v59, %v5389_v63  ;;  %v5411_v11 = vsub.f32 %v88_v60, %v5391_v3  ;;  %v5420_v9 = vand.u32 4294901760, %v212_v61  ;;  %v4817_v47 = vpack.c.bf16 %v5310_v31, %v5307_v30 }
  0x20   :  { %4810 = vmatprep.subr.bf16.mxu0 %v4809_v62  ;;  %v256_v12 = vand.u32 4294901760, %v5400_v7  ;;  %v263_v6 = vand.u32 4294901760, %v5405_v8  ;;  %916 = vrot.lane.b32.xlu0 %v5226_v0, %s5190_s20  ;;  %v4821_v48 = vpack.c.bf16 %v5405_v8, %v5400_v7  ;;  %v4833_v49 = vpack.c.bf16 %v249_v39, %v242_v38 }
  0x21   :  { %6695 = vst [vmem:[#allocation20_spill] sm:$0xff] %v5408_v10  ;;  %6696 = vst [vmem:[#allocation21_spill] sm:$0xff] %v5411_v11  ;;  %4812 = vmatpush3.bf16.msra.mxu0 %v4809_v62  ;;  %v5423_v13 = vand.u32 4294901760, %v5408_v10  ;;  %v5426_v14 = vand.u32 4294901760, %v5411_v11 }
  0x22   :  { %4333 = vmatmul.mubr.f32.gmra.mrb[2].mxu0 %v5380_v58  ;;  %v257_v18 = vsub.f32 %v5400_v7, %v256_v12  ;;  %v264_v19 = vsub.f32 %v5405_v8, %v263_v6  ;;  %918 = vrot.lane.b32.xlu1 %v5231_v1, %s5190_s20  ;;  %v4837_v30 = vpack.c.bf16 %v263_v6, %v256_v12 }
  0x23   :  { %6697 = vst [vmem:[#allocation22_spill] sm:$0xff] %v5423_v13  ;;  %6698 = vst [vmem:[#allocation23_spill] sm:$0xff] %v5426_v14  ;;  %4335 = vmatprep.mubr.f32.mxu0 %v5395_v4  ;;  %v222_v22 = vsub.f32 %v5408_v10, %v5423_v13  ;;  %v232_v23 = vsub.f32 %v5411_v11, %v5426_v14 }
  0x24   :  { %v258_v29 = vand.u32 4294901760, %v257_v18  ;;  %v265_v40 = vand.u32 4294901760, %v264_v19  ;;  %924 = vrot.lane.b32.xlu0 %v5226_v0, %s5191_s21 }
  0x25   :  { %v5444_v41 = vand.u32 4294901760, %v222_v22  ;;  %v5446_v44 = vand.u32 4294901760, %v232_v23 }
  0x26   :  { %4336 = vmatmul.mubr.f32.gmra.mrb[4].mxu0 %v5420_v9  ;;  %v4813_v46 = vpack.c.bf16 %v265_v40, %v258_v29  ;;  %926 = vrot.lane.b32.xlu1 %v5231_v1, %s5191_s21 }
  0x27   :  { %4338 = vmatprep.mubr.f32.mxu0 %v5444_v41 }
  0x28   :  { %4814 = vmatprep.subr.bf16.mxu0 %v4813_v46  ;;  %936 = vrot.lane.b32.xlu0 %v5226_v0, %s5192_s22 }
  0x29   :  { %4816 = vmatpush3.bf16.msra.mxu0 %v4813_v46 }
  0x2a   :  { %4339 = vmatmul.mubr.f32.gmra.mrb[6].mxu0 %v5446_v44  ;;  %4818 = vmatprep.subr.bf16.mxu0 %v4817_v47 }
  0x2b   :  { %4349 = vmatprep.mubr.f32.mxu0 %v5270_v16  ;;  %938 = vrot.lane.b32.xlu1 %v5231_v1, %s5192_s22 }
  0x2c   :  { %944 = vrot.lane.b32.xlu0 %v5226_v0, %s5193_s0 }
  0x2e   :  { %4350 = vmatmul.mubr.f32.vlgmr.msra.gmra.mrb[0].mxu0 %v5272_v17 }
  0x2f   :  { %4352 = vmatprep.mubr.f32.mxu0 %v5284_v21  ;;  %4820 = vmatpush3.bf16.msra.mxu0 %v4817_v47 }
  0x30   :  { %4822 = vmatprep.subr.bf16.mxu0 %v4821_v48  ;;  %946 = vrot.lane.b32.xlu1 %v5231_v1, %s5193_s0 }
  0x31   :  { %880 = vrot.lane.b32.xlu0 %v5236_v2, %s5186_s5 }
  0x32   :  { %4353 = vmatmul.mubr.f32.gmra.mrb[2].mxu0 %v5295_v26 }
  0x33   :  { %4355 = vmatprep.mubr.f32.mxu0 %v5297_v27  ;;  %4824 = vmatpush3.bf16.msra.mxu0 %v4821_v48 }
  0x34   :  { %4826 = vmatprep.subr.bf16.mxu0 %v5268_v15  ;;  %882 = vrot.lane.b32.xlu1 %v5243_v5, %s5186_s5 }
  0x35   :  { %888 = vrot.lane.b32.xlu0 %v5236_v2, %s5187_s12 }
  0x36   :  { %4356 = vmatmul.mubr.f32.gmra.mrb[4].mxu0 %v5330_v37 }
  0x37   :  { %4358 = vmatprep.mubr.f32.mxu0 %v5389_v63 }
  0x38   :  { %890 = vrot.lane.b32.xlu1 %v5243_v5, %s5187_s12 }
  0x39   :  { %900 = vrot.lane.b32.xlu0 %v5236_v2, %s5188_s15 }
  0x3a   :  { %4359 = vmatmul.mubr.f32.gmra.mrb[6].mxu0 %v5391_v3 }
  0x3b   :  { %4369 = vmatprep.mubr.f32.mxu0 %v5290_v24 }
  0x3c   :  { %902 = vrot.lane.b32.xlu1 %v5243_v5, %s5188_s15 }
  0x3d   :  { %908 = vrot.lane.b32.xlu0 %v5236_v2, %s5189_s2 }
  0x3e   :  { %4370 = vmatmul.mubr.f32.vlgmr.msra.gmra.mrb[0].mxu0 %v5293_v25 }
  0x3f   :  { %4372 = vmatprep.mubr.f32.mxu0 %v5303_v28  ;;  %4828 = vmatpush3.bf16.msra.mxu0 %v5268_v15 }
  0x40   :  { %4830 = vmatprep.subr.bf16.mxu0 %v5282_v20  ;;  %910 = vrot.lane.b32.xlu1 %v5243_v5, %s5189_s2 }
  0x41   :  { %920 = vrot.lane.b32.xlu0 %v5236_v2, %s5190_s20 }
  0x42   :  { %4373 = vmatmul.mubr.f32.gmra.mrb[2].mxu0 %v5322_v34 }
  0x43   :  { %4375 = vmatprep.mubr.f32.mxu0 %v5325_v35  ;;  %4832 = vmatpush3.bf16.msra.mxu0 %v5282_v20 }
  0x44   :  { %4834 = vmatprep.subr.bf16.mxu0 %v4833_v49  ;;  %922 = vrot.lane.b32.xlu1 %v5243_v5, %s5190_s20 }
  0x45   :  { %928 = vrot.lane.b32.xlu0 %v5236_v2, %s5191_s21 }
  0x46   :  { %4376 = vmatmul.mubr.f32.gmra.mrb[4].mxu0 %v5350_v45 }
  0x47   :  { %4378 = vmatprep.mubr.f32.mxu0 %v5408_v10 }
  0x48   :  { %930 = vrot.lane.b32.xlu1 %v5243_v5, %s5191_s21 }
  0x49   :  { %940 = vrot.lane.b32.xlu0 %v5236_v2, %s5192_s22 }
  0x4a   :  { %4379 = vmatmul.mubr.f32.gmra.mrb[6].mxu0 %v5411_v11 }
  0x4b   :  { %4389 = vmatprep.mubr.f32.mxu0 %v5316_v32 }
  0x4c   :  { %942 = vrot.lane.b32.xlu1 %v5243_v5, %s5192_s22 }
  0x4d   :  { %948 = vrot.lane.b32.xlu0 %v5236_v2, %s5193_s0 }
  0x4e   :  { %4390 = vmatmul.mubr.f32.vlgmr.msra.gmra.mrb[0].mxu0 %v5319_v33 }
  0x4f   :  { %4392 = vmatprep.mubr.f32.mxu0 %v5328_v36  ;;  %4836 = vmatpush3.bf16.msra.mxu0 %v4833_v49  ;;  %v5564_v49 = vld [vmem:[%s6630_s3] ss:$0 sm:$0xff]  ;;  %s5596_s3 = sld [smem:[#allocation2 + $0x2]] }
  0x50   :  { %4838 = vmatprep.subr.bf16.mxu0 %v4837_v30  ;;  %950 = vrot.lane.b32.xlu1 %v5243_v5, %s5193_s0  ;;  %6699 = vst [vmem:[#allocation24_spill] sm:$0xff] %v5564_v49  ;;  %vm51_vm1 = vcmp.lt.s32.totalorder %v5564_v49, 1  ;;  %vm53_vm2 = vcmp.ge.s32.totalorder %v5564_v49, 31  ;;  %vm52_vm3 = vcmp.lt.s32.totalorder %v5564_v49, 2  ;;  %vm54_vm4 = vcmp.ge.s32.totalorder %v5564_v49, 30 }
  0x51   :  { %1016 = vrot.lane.b32.xlu0 %v5226_v0, %s5194_s23 }
  0x52   :  { %4393 = vmatmul.mubr.f32.gmra.mrb[2].mxu0 %v5339_v42 }
  0x53   :  { %4395 = vmatprep.mubr.f32.mxu0 %v5342_v43  ;;  %4840 = vmatpush3.bf16.msra.mxu0 %v4837_v30 }
  0x54   :  { %4842 = vmatprep.subr.bf16.mxu0 %v5268_v15  ;;  %1018 = vrot.lane.b32.xlu1 %v5231_v1, %s5194_s23 }
  0x55   :  { %1020 = vrot.lane.b32.xlu0 %v5236_v2, %s5194_s23 }
  0x56   :  { %4396 = vmatmul.mubr.f32.gmra.mrb[4].mxu0 %v5377_v55 }
  0x57   :  { %4398 = vmatprep.mubr.f32.mxu0 %v5423_v13 }
  0x58   :  { %1022 = vrot.lane.b32.xlu1 %v5243_v5, %s5194_s23 }
  0x5a   :  { %4399 = vmatmul.mubr.f32.gmra.mrb[6].mxu0 %v5426_v14 }
  0x5b   :  { %4409 = vmatprep.mubr.f32.mxu0 %v5270_v16 }
  0x5e   :  { %4410 = vmatmul.mubr.f32.vlgmr.msra.gmra.mrb[0].mxu0 %v5272_v17 }
  0x5f   :  { %4412 = vmatprep.mubr.f32.mxu0 %v5284_v21  ;;  %4844 = vmatpush3.bf16.msra.mxu0 %v5268_v15 }
  0x60   :  { %4846 = vmatprep.subr.bf16.mxu0 %v5282_v20 }
  0x62   :  { %4413 = vmatmul.mubr.f32.gmra.mrb[2].mxu0 %v5295_v26 }
  0x63   :  { %4415 = vmatprep.mubr.f32.mxu0 %v5297_v27  ;;  %4848 = vmatpush3.bf16.msra.mxu0 %v5282_v20 }
  0x66   :  { %4416 = vmatmul.mubr.f32.gmra.mrb[4].mxu0 %v5330_v37 }
  0x67   :  { %4418 = vmatprep.mubr.f32.mxu0 %v5389_v63 }
  0x6a   :  { %4419 = vmatmul.mubr.f32.gmra.mrb[6].mxu0 %v5391_v3 }
  0x6b   :  { %4429 = vmatprep.mubr.f32.mxu0 %v5270_v16 }
  0x6e   :  { %4430 = vmatmul.mubr.f32.vlgmr.msra.gmra.mrb[0].mxu0 %v5272_v17 }
  0x6f   :  { %4432 = vmatprep.mubr.f32.mxu0 %v5284_v21 }
  0x72   :  { %4433 = vmatmul.mubr.f32.gmra.mrb[2].mxu0 %v5295_v26 }
  0x73   :  { %4435 = vmatprep.mubr.f32.mxu0 %v5297_v27 }
  0x76   :  { %4436 = vmatmul.mubr.f32.gmra.mrb[4].mxu0 %v5330_v37 }
  0x77   :  { %4438 = vmatprep.mubr.f32.mxu0 %v5389_v63 }
  0x7a   :  { %4439 = vmatmul.mubr.f32.gmra.mrb[6].mxu0 %v5391_v3 }
  0x7b   :  { %4569 = vmatprep.mubr.f32.mxu0 %v5364_v50 }
  0x82   :  { %v877_v20 = vpop.permute.xlu0 %876 }
  0x83   :  { %v885_v15 = vpop.permute.xlu1 %884 }
  0x84   :  { %v892_v14 = vsel %vm51_vm1, %v885_v15, %v877_v20 }
  0x85   :  { %v956_v43 = vmul.f32 8.0, %v892_v14 }
  0x86   :  { %v879_v38 = vpop.permute.xlu0 %878 }
  0x87   :  { %v887_v31 = vpop.permute.xlu1 %886 }
  0x88   :  { %v893_v13 = vsel %vm51_vm1, %v887_v31, %v879_v38 }
  0x89   :  { %v957_v36 = vmul.f32 8.0, %v893_v13 }
  0x8a   :  { %v897_v52 = vpop.permute.xlu0 %896 }
  0x8c   :  { %v899_v39 = vpop.permute.xlu1 %898 }
  0x8e   :  { %v905_v56 = vpop.permute.xlu0 %904 }
  0x8f   :  { %v912_v33 = vsel %vm52_vm3, %v905_v56, %v897_v52  ;;  %v48_v56 = vlaneseq }
  0x90   :  { %v907_v53 = vpop.permute.xlu1 %906  ;;  %v960_v11 = vsub.f32 %v912_v33, %v956_v43 }
  0x91   :  { %v913_v32 = vsel %vm52_vm3, %v907_v53, %v899_v39 }
  0x92   :  { %v917_v59 = vpop.permute.xlu0 %916 }
  0x94   :  { %v919_v57 = vpop.permute.xlu1 %918 }
  0x96   :  { %v925_v61 = vpop.permute.xlu0 %924 }
  0x97   :  { %v932_v55 = vsel %vm53_vm2, %v925_v61, %v917_v59 }
  0x98   :  { %v927_v60 = vpop.permute.xlu1 %926  ;;  %v988_v31 = vadd.f32 %v932_v55, %v892_v14  ;;  %v961_v14 = vsub.f32 %v913_v32, %v957_v36 }
  0x99   :  { %v933_v15 = vsel %vm53_vm2, %v927_v60, %v919_v57  ;;  %v964_v60 = vmul.f32 8.0, %v932_v55 }
  0x9a   :  { %v937_v7 = vpop.permute.xlu0 %936  ;;  %v989_v52 = vadd.f32 %v933_v15, %v893_v13  ;;  %v992_v10 = vmul.f32 1.3333334, %v988_v31  ;;  %v965_v36 = vmul.f32 8.0, %v933_v15 }
  0x9b   :  { %v968_v15 = vadd.f32 %v964_v60, %v960_v11 }
  0x9c   :  { %v993_v55 = vmul.f32 1.3333334, %v989_v52  ;;  %v969_v31 = vadd.f32 %v965_v36, %v961_v14  ;;  %v59_v36 = vstv %s5608_s26 }
  0x9d   :  { %v939_v62 = vpop.permute.xlu1 %938 }
  0x9e   :  { %v945_v12 = vpop.permute.xlu0 %944 }
  0x9f   :  { %v5584_v38 = vsel %vm54_vm4, %v945_v12, %v937_v7 }
  0xa0   :  { %v980_v39 = vadd.f32 %v5584_v38, %v912_v33  ;;  %v972_v14 = vsub.f32 %v968_v15, %v5584_v38 }
  0xa2   :  { %v947_v8 = vpop.permute.xlu1 %946 }
  0xa3   :  { %v881_v18 = vpop.permute.xlu0 %880  ;;  %v5588_v59 = vsel %vm54_vm4, %v947_v8, %v939_v62 }
  0xa4   :  { %v981_v53 = vadd.f32 %v5588_v59, %v913_v32  ;;  %v973_v60 = vsub.f32 %v969_v31, %v5588_v59 }
  0xa6   :  { %v883_v6 = vpop.permute.xlu1 %882 }
  0xa7   :  { %v889_v22 = vpop.permute.xlu0 %888 }
  0xa8   :  { %v894_v61 = vsel %vm51_vm1, %v889_v22, %v881_v18  ;;  %v985_v18 = vmul.f32 -0.083333336, %v981_v53 }
  0xa9   :  { %v958_v57 = vmul.f32 8.0, %v894_v61 }
  0xaa   :  { %v891_v19 = vpop.permute.xlu1 %890 }
  0xab   :  { %v901_v29 = vpop.permute.xlu0 %900  ;;  %v895_v7 = vsel %vm51_vm1, %v891_v19, %v883_v6  ;;  %v984_v6 = vmul.f32 -0.083333336, %v980_v39  ;;  %v997_v39 = vadd.f32 %v993_v55, %v985_v18 }
  0xac   :  { %v959_v19 = vmul.f32 8.0, %v895_v7 }
  0xad   :  { %v996_v53 = vadd.f32 %v992_v10, %v984_v6  ;;  %v58_v10 = vstv %s5596_s3 }
  0xae   :  { %v903_v23 = vpop.permute.xlu1 %902 }
  0xaf   :  { %v909_v46 = vpop.permute.xlu0 %908 }
  0xb0   :  { %v914_v8 = vsel %vm52_vm3, %v909_v46, %v901_v29  ;;  %v1001_v29 = vmul.f32 2.5, %v5231_v1  ;;  %v1000_v46 = vmul.f32 2.5, %v5226_v0 }
  0xb1   :  { %v962_v22 = vsub.f32 %v914_v8, %v958_v57 }
  0xb2   :  { %v911_v40 = vpop.permute.xlu1 %910  ;;  %v1004_v55 = vsub.f32 %v996_v53, %v1000_v46 }
  0xb3   :  { %v921_v48 = vpop.permute.xlu0 %920  ;;  %v915_v62 = vsel %vm52_vm3, %v911_v40, %v903_v23 }
  0xb6   :  { %v923_v47 = vpop.permute.xlu1 %922 }
  0xb7   :  { %v929_v50 = vpop.permute.xlu0 %928 }
  0xb8   :  { %v934_v43 = vsel %vm53_vm2, %v929_v50, %v921_v48 }
  0xb9   :  { %v990_v23 = vadd.f32 %v934_v43, %v894_v61 }
  0xba   :  { %v931_v30 = vpop.permute.xlu1 %930 }
  0xbb   :  { %v941_v20 = vpop.permute.xlu0 %940  ;;  %v935_v33 = vsel %vm53_vm2, %v931_v30, %v923_v47  ;;  %v5619_v30 = vand.u32 127, %v48_v56  ;;  %v994_v61 = vmul.f32 1.3333334, %v990_v23 }
  0xbc   :  { %v991_v40 = vadd.f32 %v935_v33, %v895_v7  ;;  %v967_v52 = vmul.f32 8.0, %v935_v33 }
  0xbd   :  { %6700 = vst [vmem:[#allocation25_spill] sm:$0xff] %v5619_v30  ;;  %vm50_vm5 = vcmp.lt.s32.totalorder %v5619_v30, 64 }
  0xbe   :  { %v943_v42 = vpop.permute.xlu1 %942  ;;  %v995_v57 = vmul.f32 1.3333334, %v991_v40  ;;  %v5643_v15 = vsel %vm50_vm5, %v58_v10, %v59_v36 }
  0xbf   :  { %v949_v13 = vpop.permute.xlu0 %948 }
  0xc0   :  { %v954_v50 = vsel %vm54_vm4, %v949_v13, %v941_v20  ;;  %v963_v20 = vsub.f32 %v915_v62, %v959_v19  ;;  %v1005_v19 = vsub.f32 %v997_v39, %v1001_v29  ;;  %v1008_v39 = vmul.f32 10000.0, %v1004_v55 }
  0xc1   :  { %v982_v48 = vadd.f32 %v954_v50, %v914_v8 }
  0xc2   :  { %v951_v12 = vpop.permute.xlu1 %950  ;;  %v971_v13 = vadd.f32 %v967_v52, %v963_v20 }
  0xc3   :  { %v5606_v32 = vsel %vm54_vm4, %v951_v12, %v943_v42  ;;  %v966_v42 = vmul.f32 8.0, %v934_v43  ;;  %v986_v56 = vmul.f32 -0.083333336, %v982_v48  ;;  %v56_v43 = vstv %s5616_s28  ;;  %v1017_v6 = vpop.permute.xlu0 %1016 }
  0xc4   :  { %v983_v47 = vadd.f32 %v5606_v32, %v915_v62  ;;  %v55_v62 = vstv %s5610_s27  ;;  %v976_v48 = vmul.f32 8.333333, %v972_v14  ;;  %v1024_v31 = vsel %vm50_vm5, %v5226_v0, %v1017_v6 }
  0xc5   :  { %v970_v7 = vadd.f32 %v966_v42, %v962_v22  ;;  %v1003_v42 = vmul.f32 2.5, %v5243_v5  ;;  %v5635_v23 = vsel %vm50_vm5, %v55_v62, %v56_v43  ;;  %v998_v40 = vadd.f32 %v994_v61, %v986_v56 }
  0xc6   :  { %v987_v12 = vmul.f32 -0.083333336, %v983_v47  ;;  %v1019_v18 = vpop.permute.xlu1 %1018  ;;  %v1002_v47 = vmul.f32 2.5, %v5236_v2  ;;  %v975_v46 = vsub.f32 %v971_v13, %v5606_v32  ;;  %v1028_v20 = vsel %vm50_vm5, %v1017_v6, %v5226_v0 }
  0xc7   :  { %v974_v8 = vsub.f32 %v970_v7, %v954_v50  ;;  %v1025_v38 = vsel %vm50_vm5, %v5231_v1, %v1019_v18  ;;  %v977_v50 = vmul.f32 8.333333, %v973_v60  ;;  %v1029_v52 = vsel %vm50_vm5, %v1019_v18, %v5231_v1 }
  0xc8   :  { %v999_v22 = vadd.f32 %v995_v57, %v987_v12  ;;  %v1021_v57 = vpop.permute.xlu0 %1020  ;;  %v1038_v7 = vmul.f32 %v1025_v38, %v5635_v23  ;;  %v1009_v12 = vmul.f32 10000.0, %v1005_v19  ;;  %v1037_v14 = vmul.f32 %v1024_v31, %v5635_v23 }
  0xc9   :  { %v978_v53 = vmul.f32 8.333333, %v974_v8  ;;  %v5661_v62 = vstv %s5624_s29  ;;  %v1006_v43 = vsub.f32 %v998_v40, %v1002_v47  ;;  %v1049_v13 = vmul.f32 %v1028_v20, %v5643_v15 }
  0xca   :  { %v1023_v61 = vpop.permute.xlu1 %1022  ;;  %v1007_v56 = vsub.f32 %v999_v22, %v1003_v42  ;;  %v1050_v10 = vmul.f32 %v1029_v52, %v5643_v15  ;;  %v1026_v36 = vsel %vm50_vm5, %v5236_v2, %v1021_v57  ;;  %v979_v6 = vmul.f32 8.333333, %v975_v46 }
  0xcb   :  { %v1027_v32 = vsel %vm50_vm5, %v5243_v5, %v1023_v61  ;;  %v1031_v18 = vsel %vm50_vm5, %v1023_v61, %v5243_v5  ;;  %v1030_v19 = vsel %vm50_vm5, %v1021_v57, %v5236_v2  ;;  %v1039_v20 = vmul.f32 %v1026_v36, %v5635_v23 }
  0xcc   :  { %v1040_v38 = vmul.f32 %v1027_v32, %v5635_v23  ;;  %v1011_v47 = vmul.f32 10000.0, %v1007_v56  ;;  %v1052_v61 = vmul.f32 %v1031_v18, %v5643_v15 }
 0x141   :  { %v4431_v11 = vpop.f32.mrb[0].mxu0 }
 0x142   :  { %v830_v33 = vpop.f32.mrb[1].mxu0  ;;  %v1042_v42 = vmul.f32 %v4431_v11, %v1038_v7  ;;  %v1051_v11 = vmul.f32 %v1030_v19, %v5643_v15 }
 0x143   :  { %v1041_v31 = vmul.f32 %v1037_v14, %v830_v33 }
 0x144   :  { %v1055_v18 = vmul.f32 %v1051_v11, %v978_v53 }
 0x145   :  { %v4434_v59 = vpop.f32.mrb[2].mxu0 }
 0x146   :  { %v842_v29 = vpop.f32.mrb[3].mxu0 }
 0x147   :  { %v1043_v14 = vmul.f32 %v1039_v20, %v842_v29 }
 0x149   :  { %v4437_v60 = vpop.f32.mrb[4].mxu0 }
 0x14a   :  { %v1013_v55 = vadd.f32 %v4437_v60, %v1009_v12  ;;  %v854_v8 = vpop.f32.mrb[5].mxu0  ;;  %v1010_v12 = vmul.f32 10000.0, %v1006_v43  ;;  %v1054_v60 = vmul.f32 %v1050_v10, %v977_v50  ;;  %v1056_v43 = vmul.f32 %v1052_v61, %v979_v6 }
 0x14b   :  { %v1012_v22 = vadd.f32 %v1008_v39, %v854_v8  ;;  %v1053_v39 = vmul.f32 %v1049_v13, %v976_v48 }
 0x14c   :  { %v1034_v40 = vmul.f32 %v5661_v62, %v1013_v55  ;;  %v1044_v55 = vmul.f32 %v4434_v59, %v1040_v38 }
 0x14d   :  { %v1033_v46 = vmul.f32 %v5661_v62, %v1012_v22  ;;  %v4440_v52 = vpop.f32.mrb[6].mxu0 }
 0x14e   :  { %v1046_v49 = vadd.f32 %v1042_v42, %v1034_v40  ;;  %v1015_v30 = vadd.f32 %v4440_v52, %v1011_v47  ;;  %v866_v57 = vpop.f32.mrb[7].mxu0 }
 0x14f   :  { %v1045_v7 = vadd.f32 %v1041_v31, %v1033_v46  ;;  %v1014_v32 = vadd.f32 %v1010_v12, %v866_v57 }
 0x150   :  { %v5680_v56 = vadd.f32 %v1054_v60, %v1046_v49  ;;  %v1036_v33 = vmul.f32 %v5661_v62, %v1015_v30 }
 0x151   :  { %v5683_v36 = vadd.f32 %v1053_v39, %v1045_v7  ;;  %v1035_v50 = vmul.f32 %v5661_v62, %v1014_v32 }
 0x152   :  { %6701 = vst [vmem:[#allocation26_spill] sm:$0xff] %v5680_v56  ;;  %v1062_v10 = vmul.f32 0.25, %v5680_v56  ;;  %v1048_v8 = vadd.f32 %v1044_v55, %v1036_v33 }
 0x153   :  { %6702 = vst [vmem:[#allocation27_spill] sm:$0xff] %v5683_v36  ;;  %v1061_v48 = vmul.f32 0.25, %v5683_v36  ;;  %v1047_v13 = vadd.f32 %v1043_v14, %v1035_v50 }
 0x154   :  { %v5689_v19 = vadd.f32 %v1062_v10, %v5231_v1  ;;  %v5691_v49 = vadd.f32 %v1056_v43, %v1048_v8 }
 0x155   :  { %v5694_v30 = vadd.f32 %v1061_v48, %v5226_v0  ;;  %v5696_v59 = vadd.f32 %v1055_v18, %v1047_v13  ;;  %v6705_v18 = vld [vmem:[#allocation20_spill] sm:$0xff]  ;;  %v6706_v48 = vld [vmem:[#allocation21_spill] sm:$0xff] }
 0x156   :  { %6703 = vst [vmem:[#allocation28_spill] sm:$0xff] %v5691_v49  ;;  %v1064_v29 = vmul.f32 0.25, %v5691_v49  ;;  %1857 = vrot.lane.b32.xlu1 %v5689_v19, %s5186_s5  ;;  %v1073_v53 = vand.u32 4294901760, %v5689_v19  ;;  %v6707_v13 = vld [vmem:[#allocation8_spill] sm:$0xff] }
 0x157   :  { %6704 = vst [vmem:[#allocation29_spill] sm:$0xff] %v5696_v59  ;;  %v1063_v6 = vmul.f32 0.25, %v5696_v59  ;;  %1855 = vrot.lane.b32.xlu0 %v5694_v30, %s5186_s5  ;;  %v1070_v1 = vand.u32 4294901760, %v5694_v30 }
 0x158   :  { %v5707_v22 = vadd.f32 %v1064_v29, %v5243_v5  ;;  %v5710_v0 = vsub.f32 %v5689_v19, %v1073_v53  ;;  %v6708_v29 = vld [vmem:[#allocation9_spill] sm:$0xff] }
 0x159   :  { %v5713_v42 = vadd.f32 %v1063_v6, %v5236_v2  ;;  %v5715_v38 = vpack.c.bf16 %v1073_v53, %v1070_v1  ;;  %v5718_v40 = vsub.f32 %v5694_v30, %v1070_v1  ;;  %v6709_v6 = vld [vmem:[#allocation12_spill] sm:$0xff]  ;;  %v6710_v1 = vld [vmem:[#allocation13_spill] sm:$0xff] }
 0x15a   :  { %1865 = vrot.lane.b32.xlu1 %v5689_v19, %s5187_s12  ;;  %v1079_v47 = vand.u32 4294901760, %v5707_v22  ;;  %v1228_v31 = vand.u32 4294901760, %v5710_v0 }
 0x15b   :  { %1863 = vrot.lane.b32.xlu0 %v5694_v30, %s5187_s12  ;;  %4850 = vmatprep.subr.bf16.mxu1 %v5715_v38  ;;  %v1076_v2 = vand.u32 4294901760, %v5713_v42  ;;  %v1221_v5 = vand.u32 4294901760, %v5718_v40  ;;  %v4865_v43 = vpack.c.bf16 %v5710_v0, %v5718_v40 }
 0x15c   :  { %4852 = vmatpush3.bf16.msra.mxu1 %v5715_v38  ;;  %v1229_v20 = vsub.f32 %v5710_v0, %v1228_v31  ;;  %v5734_v46 = vsub.f32 %v5707_v22, %v1079_v47  ;;  %v6711_v0 = vld [vmem:[#allocation14_spill] sm:$0xff] }
 0x15d   :  { %v5736_v52 = vpack.c.bf16 %v1079_v47, %v1076_v2  ;;  %v1222_v12 = vsub.f32 %v5718_v40, %v1221_v5  ;;  %v5742_v60 = vsub.f32 %v5713_v42, %v1076_v2  ;;  %v4881_v8 = vpack.c.bf16 %v1228_v31, %v1221_v5  ;;  %v6712_v40 = vld [vmem:[#allocation17_spill] sm:$0xff]  ;;  %v6713_v47 = vld [vmem:[#allocation22_spill] sm:$0xff]  ;;  %v6714_v31 = vld [vmem:[#allocation23_spill] sm:$0xff] }
 0x15e   :  { %1877 = vrot.lane.b32.xlu1 %v5689_v19, %s5188_s15  ;;  %v1230_v61 = vand.u32 4294901760, %v1229_v20  ;;  %v1242_v57 = vand.u32 4294901760, %v5734_v46 }
 0x15f   :  { %1875 = vrot.lane.b32.xlu0 %v5694_v30, %s5188_s15  ;;  %4854 = vmatprep.subr.bf16.mxu1 %v5736_v52  ;;  %v1223_v39 = vand.u32 4294901760, %v1222_v12  ;;  %v1235_v11 = vand.u32 4294901760, %v5742_v60  ;;  %v4869_v10 = vpack.c.bf16 %v5734_v46, %v5742_v60 }
 0x160   :  { %4856 = vmatpush3.bf16.msra.mxu1 %v5736_v52  ;;  %v1243_v7 = vsub.f32 %v5734_v46, %v1242_v57 }
 0x161   :  { %v4857_v32 = vpack.c.bf16 %v1230_v61, %v1223_v39  ;;  %v1236_v55 = vsub.f32 %v5742_v60, %v1235_v11  ;;  %v4885_v53 = vpack.c.bf16 %v1242_v57, %v1235_v11 }
 0x162   :  { %1885 = vrot.lane.b32.xlu1 %v5689_v19, %s5189_s2  ;;  %v1244_v33 = vand.u32 4294901760, %v1243_v7 }
 0x163   :  { %1883 = vrot.lane.b32.xlu0 %v5694_v30, %s5189_s2  ;;  %4450 = vmatmul.mubr.f32.vlgmr.msra.gmra.mrb[0].mxu1 %v5366_v51  ;;  %v1237_v14 = vand.u32 4294901760, %v1236_v55 }
 0x164   :  { %4858 = vmatprep.subr.bf16.mxu1 %v4857_v32  ;;  %4452 = vmatprep.mubr.f32.mxu1 %v5374_v54 }
 0x165   :  { %4860 = vmatpush3.bf16.msra.mxu1 %v4857_v32  ;;  %v4861_v50 = vpack.c.bf16 %v1244_v33, %v1237_v14 }
 0x166   :  { %1897 = vrot.lane.b32.xlu1 %v5689_v19, %s5190_s20 }
 0x167   :  { %1895 = vrot.lane.b32.xlu0 %v5694_v30, %s5190_s20  ;;  %4453 = vmatmul.mubr.f32.gmra.mrb[2].mxu1 %v5380_v58 }
 0x168   :  { %4862 = vmatprep.subr.bf16.mxu1 %v4861_v50  ;;  %4455 = vmatprep.mubr.f32.mxu1 %v5395_v4 }
 0x169   :  { %4864 = vmatpush3.bf16.msra.mxu1 %v4861_v50 }
 0x16a   :  { %4866 = vmatprep.subr.bf16.mxu1 %v4865_v43  ;;  %1905 = vrot.lane.b32.xlu1 %v5689_v19, %s5191_s21 }
 0x16b   :  { %1903 = vrot.lane.b32.xlu0 %v5694_v30, %s5191_s21  ;;  %4456 = vmatmul.mubr.f32.gmra.mrb[4].mxu1 %v5420_v9 }
 0x16c   :  { %4458 = vmatprep.mubr.f32.mxu1 %v5444_v41 }
 0x16e   :  { %1917 = vrot.lane.b32.xlu1 %v5689_v19, %s5192_s22 }
 0x16f   :  { %1915 = vrot.lane.b32.xlu0 %v5694_v30, %s5192_s22  ;;  %4459 = vmatmul.mubr.f32.gmra.mrb[6].mxu1 %v5446_v44 }
 0x170   :  { %4469 = vmatprep.mubr.f32.mxu1 %v5270_v16 }
 0x172   :  { %1925 = vrot.lane.b32.xlu1 %v5689_v19, %s5193_s0 }
 0x173   :  { %1923 = vrot.lane.b32.xlu0 %v5694_v30, %s5193_s0  ;;  %4470 = vmatmul.mubr.f32.vlgmr.msra.gmra.mrb[0].mxu1 %v5272_v17 }
 0x174   :  { %4868 = vmatpush3.bf16.msra.mxu1 %v4865_v43  ;;  %4472 = vmatprep.mubr.f32.mxu1 %v5284_v21 }
 0x175   :  { %4870 = vmatprep.subr.bf16.mxu1 %v4869_v10 }
 0x176   :  { %1861 = vrot.lane.b32.xlu1 %v5707_v22, %s5186_s5 }
 0x177   :  { %1859 = vrot.lane.b32.xlu0 %v5713_v42, %s5186_s5  ;;  %4473 = vmatmul.mubr.f32.gmra.mrb[2].mxu1 %v5295_v26 }
 0x178   :  { %4872 = vmatpush3.bf16.msra.mxu1 %v4869_v10  ;;  %4475 = vmatprep.mubr.f32.mxu1 %v5297_v27 }
 0x179   :  { %4874 = vmatprep.subr.bf16.mxu1 %v5715_v38 }
 0x17a   :  { %1869 = vrot.lane.b32.xlu1 %v5707_v22, %s5187_s12 }
 0x17b   :  { %1867 = vrot.lane.b32.xlu0 %v5713_v42, %s5187_s12  ;;  %4476 = vmatmul.mubr.f32.gmra.mrb[4].mxu1 %v5330_v37 }
 0x17c   :  { %4478 = vmatprep.mubr.f32.mxu1 %v5389_v63 }
 0x17e   :  { %1881 = vrot.lane.b32.xlu1 %v5707_v22, %s5188_s15 }
 0x17f   :  { %1879 = vrot.lane.b32.xlu0 %v5713_v42, %s5188_s15  ;;  %4479 = vmatmul.mubr.f32.gmra.mrb[6].mxu1 %v5391_v3 }
 0x180   :  { %4489 = vmatprep.mubr.f32.mxu1 %v5290_v24 }
 0x182   :  { %1889 = vrot.lane.b32.xlu1 %v5707_v22, %s5189_s2 }
 0x183   :  { %1887 = vrot.lane.b32.xlu0 %v5713_v42, %s5189_s2  ;;  %4490 = vmatmul.mubr.f32.vlgmr.msra.gmra.mrb[0].mxu1 %v5293_v25 }
 0x184   :  { %4876 = vmatpush3.bf16.msra.mxu1 %v5715_v38  ;;  %4492 = vmatprep.mubr.f32.mxu1 %v5303_v28 }
 0x185   :  { %4878 = vmatprep.subr.bf16.mxu1 %v5736_v52 }
 0x186   :  { %1901 = vrot.lane.b32.xlu1 %v5707_v22, %s5190_s20 }
 0x187   :  { %1899 = vrot.lane.b32.xlu0 %v5713_v42, %s5190_s20  ;;  %4493 = vmatmul.mubr.f32.gmra.mrb[2].mxu1 %v5322_v34 }
 0x188   :  { %4880 = vmatpush3.bf16.msra.mxu1 %v5736_v52  ;;  %4495 = vmatprep.mubr.f32.mxu1 %v5325_v35 }
 0x189   :  { %4882 = vmatprep.subr.bf16.mxu1 %v4881_v8 }
 0x18a   :  { %1909 = vrot.lane.b32.xlu1 %v5707_v22, %s5191_s21 }
 0x18b   :  { %1907 = vrot.lane.b32.xlu0 %v5713_v42, %s5191_s21  ;;  %4496 = vmatmul.mubr.f32.gmra.mrb[4].mxu1 %v5350_v45 }
 0x18c   :  { %4498 = vmatprep.mubr.f32.mxu1 %v6705_v18 }
 0x18e   :  { %1921 = vrot.lane.b32.xlu1 %v5707_v22, %s5192_s22 }
 0x18f   :  { %1919 = vrot.lane.b32.xlu0 %v5713_v42, %s5192_s22  ;;  %4499 = vmatmul.mubr.f32.gmra.mrb[6].mxu1 %v6706_v48 }
 0x190   :  { %4509 = vmatprep.mubr.f32.mxu1 %v6707_v13 }
 0x192   :  { %1929 = vrot.lane.b32.xlu1 %v5707_v22, %s5193_s0 }
 0x193   :  { %1927 = vrot.lane.b32.xlu0 %v5713_v42, %s5193_s0  ;;  %4510 = vmatmul.mubr.f32.vlgmr.msra.gmra.mrb[0].mxu1 %v6708_v29 }
 0x194   :  { %4884 = vmatpush3.bf16.msra.mxu1 %v4881_v8  ;;  %4512 = vmatprep.mubr.f32.mxu1 %v6709_v6 }
 0x195   :  { %4886 = vmatprep.subr.bf16.mxu1 %v4885_v53 }
 0x196   :  { %1997 = vrot.lane.b32.xlu1 %v5689_v19, %s5194_s23 }
 0x197   :  { %1995 = vrot.lane.b32.xlu0 %v5694_v30, %s5194_s23  ;;  %4513 = vmatmul.mubr.f32.gmra.mrb[2].mxu1 %v6710_v1 }
 0x198   :  { %4888 = vmatpush3.bf16.msra.mxu1 %v4885_v53  ;;  %4515 = vmatprep.mubr.f32.mxu1 %v6711_v0 }
 0x199   :  { %4890 = vmatprep.subr.bf16.mxu1 %v5715_v38 }
 0x19a   :  { %2001 = vrot.lane.b32.xlu1 %v5707_v22, %s5194_s23 }
 0x19b   :  { %1999 = vrot.lane.b32.xlu0 %v5713_v42, %s5194_s23  ;;  %4516 = vmatmul.mubr.f32.gmra.mrb[4].mxu1 %v6712_v40 }
 0x19c   :  { %4518 = vmatprep.mubr.f32.mxu1 %v6713_v47 }
 0x19f   :  { %4519 = vmatmul.mubr.f32.gmra.mrb[6].mxu1 %v6714_v31 }
 0x1a0   :  { %4529 = vmatprep.mubr.f32.mxu1 %v5270_v16 }
 0x1a3   :  { %4530 = vmatmul.mubr.f32.vlgmr.msra.gmra.mrb[0].mxu1 %v5272_v17 }
 0x1a4   :  { %4892 = vmatpush3.bf16.msra.mxu1 %v5715_v38  ;;  %4532 = vmatprep.mubr.f32.mxu1 %v5284_v21  ;;  %v6715_v38 = vld [vmem:[#allocation16_spill] sm:$0xff] }
 0x1a5   :  { %4894 = vmatprep.subr.bf16.mxu1 %v5736_v52 }
 0x1a7   :  { %4533 = vmatmul.mubr.f32.gmra.mrb[2].mxu1 %v5295_v26 }
 0x1a8   :  { %4896 = vmatpush3.bf16.msra.mxu1 %v5736_v52  ;;  %4535 = vmatprep.mubr.f32.mxu1 %v5297_v27 }
 0x1ab   :  { %4536 = vmatmul.mubr.f32.gmra.mrb[4].mxu1 %v5330_v37 }
 0x1ac   :  { %4538 = vmatprep.mubr.f32.mxu1 %v5389_v63 }
 0x1af   :  { %4539 = vmatmul.mubr.f32.gmra.mrb[6].mxu1 %v5391_v3 }
 0x1b0   :  { %4549 = vmatprep.mubr.f32.mxu1 %v5270_v16 }
 0x1b3   :  { %4550 = vmatmul.mubr.f32.vlgmr.msra.gmra.mrb[0].mxu1 %v5272_v17 }
 0x1b4   :  { %4552 = vmatprep.mubr.f32.mxu1 %v5284_v21 }
 0x1b7   :  { %4553 = vmatmul.mubr.f32.gmra.mrb[2].mxu1 %v5295_v26 }
 0x1b8   :  { %4555 = vmatprep.mubr.f32.mxu1 %v5297_v27 }
 0x1bb   :  { %4556 = vmatmul.mubr.f32.gmra.mrb[4].mxu1 %v5330_v37 }
 0x1bc   :  { %4558 = vmatprep.mubr.f32.mxu1 %v5389_v63 }
 0x1bf   :  { %4559 = vmatmul.mubr.f32.gmra.mrb[6].mxu1 %v5391_v3 }
 0x1c0   :  { %4689 = vmatprep.mubr.f32.mxu1 %v6715_v38 }
 0x1c8   :  { %v1858_v2 = vpop.permute.xlu1 %1857 }
 0x1c9   :  { %v1856_v5 = vpop.permute.xlu0 %1855 }
 0x1cc   :  { %v1866_v20 = vpop.permute.xlu1 %1865 }
 0x1cd   :  { %v1864_v46 = vpop.permute.xlu0 %1863  ;;  %v1872_v13 = vsel %vm51_vm1, %v1866_v20, %v1858_v2 }
 0x1ce   :  { %v1871_v48 = vsel %vm51_vm1, %v1864_v46, %v1856_v5  ;;  %v1936_v20 = vmul.f32 8.0, %v1872_v13 }
 0x1cf   :  { %v1935_v46 = vmul.f32 8.0, %v1871_v48 }
 0x1d0   :  { %v1878_v52 = vpop.permute.xlu1 %1877 }
 0x1d1   :  { %v1876_v12 = vpop.permute.xlu0 %1875 }
 0x1d4   :  { %v1886_v60 = vpop.permute.xlu1 %1885 }
 0x1d5   :  { %v1884_v61 = vpop.permute.xlu0 %1883  ;;  %v1892_v18 = vsel %vm52_vm3, %v1886_v60, %v1878_v52 }
 0x1d6   :  { %v1891_v35 = vsel %vm52_vm3, %v1884_v61, %v1876_v12 }
 0x1d8   :  { %v1898_v57 = vpop.permute.xlu1 %1897 }
 0x1d9   :  { %v1896_v39 = vpop.permute.xlu0 %1895 }
 0x1dc   :  { %v1906_v11 = vpop.permute.xlu1 %1905 }
 0x1dd   :  { %v1904_v7 = vpop.permute.xlu0 %1903 }
 0x1e0   :  { %v1918_v32 = vpop.permute.xlu1 %1917 }
 0x1e1   :  { %v1916_v55 = vpop.permute.xlu0 %1915 }
 0x1e4   :  { %v1926_v33 = vpop.permute.xlu1 %1925 }
 0x1e5   :  { %v1924_v14 = vpop.permute.xlu0 %1923  ;;  %v5888_v6 = vsel %vm54_vm4, %v1926_v33, %v1918_v32  ;;  %v1912_v32 = vsel %vm53_vm2, %v1906_v11, %v1898_v57 }
 0x1e6   :  { %v5892_v29 = vsel %vm54_vm4, %v1924_v14, %v1916_v55  ;;  %v1911_v55 = vsel %vm53_vm2, %v1904_v7, %v1896_v39  ;;  %v1960_v33 = vadd.f32 %v5888_v6, %v1892_v18  ;;  %v1968_v52 = vadd.f32 %v1912_v32, %v1872_v13 }
 0x1e7   :  { %v1959_v2 = vadd.f32 %v5892_v29, %v1891_v35  ;;  %v1967_v60 = vadd.f32 %v1911_v55, %v1871_v48  ;;  %v1944_v61 = vmul.f32 8.0, %v1912_v32 }
 0x1e8   :  { %v1862_v50 = vpop.permute.xlu1 %1861  ;;  %v1964_v57 = vmul.f32 -0.083333336, %v1960_v33 }
 0x1e9   :  { %v1860_v43 = vpop.permute.xlu0 %1859  ;;  %v1963_v7 = vmul.f32 -0.083333336, %v1959_v2 }
 0x1ec   :  { %v1870_v10 = vpop.permute.xlu1 %1869 }
 0x1ed   :  { %v1868_v8 = vpop.permute.xlu0 %1867  ;;  %v1874_v32 = vsel %vm51_vm1, %v1870_v10, %v1862_v50  ;;  %v1980_v50 = vmul.f32 2.5, %v5689_v19  ;;  %v1979_v10 = vmul.f32 2.5, %v5694_v30 }
 0x1f0   :  { %v1882_v53 = vpop.permute.xlu1 %1881 }
 0x1f1   :  { %v1880_v38 = vpop.permute.xlu0 %1879 }
 0x1f4   :  { %v1890_v59 = vpop.permute.xlu1 %1889 }
 0x1f5   :  { %v1888_v49 = vpop.permute.xlu0 %1887  ;;  %v1894_v39 = vsel %vm52_vm3, %v1890_v59, %v1882_v53  ;;  %v1972_v59 = vmul.f32 1.3333334, %v1968_v52  ;;  %v1971_v53 = vmul.f32 1.3333334, %v1967_v60  ;;  %v1938_v60 = vmul.f32 8.0, %v1874_v32 }
 0x1f7   :  { %v1975_v34 = vadd.f32 %v1971_v53, %v1963_v7  ;;  %v1942_v53 = vsub.f32 %v1894_v39, %v1938_v60 }
 0x1f8   :  { %v1902_v36 = vpop.permute.xlu1 %1901 }
 0x1f9   :  { %v1900_v56 = vpop.permute.xlu0 %1899 }
 0x1fc   :  { %v1910_v31 = vpop.permute.xlu1 %1909 }
 0x1fd   :  { %v1908_v47 = vpop.permute.xlu0 %1907  ;;  %v1914_v11 = vsel %vm53_vm2, %v1910_v31, %v1902_v36  ;;  %v1873_v36 = vsel %vm51_vm1, %v1868_v8, %v1860_v43 }
 0x1fe   :  { %v1913_v13 = vsel %vm53_vm2, %v1908_v47, %v1900_v56  ;;  %v1970_v31 = vadd.f32 %v1914_v11, %v1874_v32  ;;  %v1976_v47 = vadd.f32 %v1972_v59, %v1964_v57  ;;  %v1937_v1 = vmul.f32 8.0, %v1873_v36 }
 0x1ff   :  { %v1982_v32 = vmul.f32 2.5, %v5707_v22 }
 0x200   :  { %v1922_v40 = vpop.permute.xlu1 %1921  ;;  %v1974_v43 = vmul.f32 1.3333334, %v1970_v31 }
 0x201   :  { %v1920_v0 = vpop.permute.xlu0 %1919 }
 0x204   :  { %v1930_v45 = vpop.permute.xlu1 %1929 }
 0x205   :  { %v1928_v14 = vpop.permute.xlu0 %1927  ;;  %v5910_v5 = vsel %vm54_vm4, %v1930_v45, %v1922_v40  ;;  %v1893_v45 = vsel %vm52_vm3, %v1888_v49, %v1880_v38  ;;  %v1940_v40 = vsub.f32 %v1892_v18, %v1936_v20  ;;  %v1969_v49 = vadd.f32 %v1913_v13, %v1873_v36 }
 0x206   :  { %v5914_v12 = vsel %vm54_vm4, %v1928_v14, %v1920_v0  ;;  %v1962_v48 = vadd.f32 %v5910_v5, %v1894_v39  ;;  %v1943_v0 = vmul.f32 8.0, %v1911_v55  ;;  %v1939_v14 = vsub.f32 %v1891_v35, %v1935_v46 }
 0x207   :  { %v1961_v33 = vadd.f32 %v5914_v12, %v1893_v45  ;;  %v1948_v38 = vadd.f32 %v1944_v61, %v1940_v40  ;;  %v1946_v46 = vmul.f32 8.0, %v1914_v11  ;;  %v1945_v61 = vmul.f32 8.0, %v1913_v13 }
 0x208   :  { %v1966_v2 = vmul.f32 -0.083333336, %v1962_v48  ;;  %v1998_v56 = vpop.permute.xlu1 %1997  ;;  %v1947_v18 = vadd.f32 %v1943_v0, %v1939_v14  ;;  %v1973_v48 = vmul.f32 1.3333334, %v1969_v49  ;;  %v1984_v0 = vsub.f32 %v1976_v47, %v1980_v50 }
 0x209   :  { %v1965_v55 = vmul.f32 -0.083333336, %v1961_v33  ;;  %v1952_v52 = vsub.f32 %v1948_v38, %v5888_v6  ;;  %v1996_v8 = vpop.permute.xlu0 %1995  ;;  %v2008_v7 = vsel %vm50_vm5, %v1998_v56, %v5689_v19  ;;  %v1983_v33 = vsub.f32 %v1975_v34, %v1979_v10 }
 0x20a   :  { %v1951_v40 = vsub.f32 %v1947_v18, %v5892_v29  ;;  %v1978_v59 = vadd.f32 %v1974_v43, %v1966_v2  ;;  %v1941_v14 = vsub.f32 %v1893_v45, %v1937_v1  ;;  %v2028_v11 = vmul.f32 %v2008_v7, %v5643_v15 }
 0x20b   :  { %v1977_v36 = vadd.f32 %v1973_v48, %v1965_v55  ;;  %v1956_v31 = vmul.f32 8.333333, %v1952_v52  ;;  %v2007_v13 = vsel %vm50_vm5, %v1996_v8, %v5694_v30  ;;  %v1981_v38 = vmul.f32 2.5, %v5713_v42 }
 0x20c   :  { %v1950_v29 = vadd.f32 %v1946_v46, %v1942_v53  ;;  %v1949_v47 = vadd.f32 %v1945_v61, %v1941_v14  ;;  %v2004_v34 = vsel %vm50_vm5, %v5689_v19, %v1998_v56  ;;  %v2003_v1 = vsel %vm50_vm5, %v5694_v30, %v1996_v8  ;;  %v2002_v45 = vpop.permute.xlu1 %2001 }
 0x20d   :  { %v1955_v39 = vmul.f32 8.333333, %v1951_v40  ;;  %v2000_v2 = vpop.permute.xlu0 %1999  ;;  %v1988_v18 = vmul.f32 10000.0, %v1984_v0  ;;  %v1987_v55 = vmul.f32 10000.0, %v1983_v33  ;;  %v1986_v50 = vsub.f32 %v1978_v59, %v1982_v32 }
 0x20e   :  { %v1954_v10 = vsub.f32 %v1950_v29, %v5910_v5  ;;  %v1953_v52 = vsub.f32 %v1949_v47, %v5914_v12  ;;  %v2027_v60 = vmul.f32 %v2007_v13, %v5643_v15  ;;  %v1985_v46 = vsub.f32 %v1977_v36, %v1981_v38 }
 0x20f   :  { %v2032_v61 = vmul.f32 %v2028_v11, %v1956_v31  ;;  %v2016_v19 = vmul.f32 %v2004_v34, %v5635_v23  ;;  %v2015_v56 = vmul.f32 %v2003_v1, %v5635_v23  ;;  %v2006_v48 = vsel %vm50_vm5, %v5707_v22, %v2002_v45 }
 0x210   :  { %v2010_v5 = vsel %vm50_vm5, %v2002_v45, %v5707_v22  ;;  %v2005_v12 = vsel %vm50_vm5, %v5713_v42, %v2000_v2  ;;  %v2009_v40 = vsel %vm50_vm5, %v2000_v2, %v5713_v42  ;;  %v1990_v59 = vmul.f32 10000.0, %v1986_v50 }
 0x211   :  { %v2031_v53 = vmul.f32 %v2027_v60, %v1955_v39  ;;  %v1989_v31 = vmul.f32 10000.0, %v1985_v46  ;;  %v2030_v22 = vmul.f32 %v2010_v5, %v5643_v15  ;;  %v2018_v11 = vmul.f32 %v2006_v48, %v5635_v23 }
 0x212   :  { %v2029_v47 = vmul.f32 %v2009_v40, %v5643_v15  ;;  %v2017_v42 = vmul.f32 %v2005_v12, %v5635_v23  ;;  %v1958_v1 = vmul.f32 8.333333, %v1954_v10  ;;  %v1957_v2 = vmul.f32 8.333333, %v1953_v52  ;;  %v5993_v52 = vld [vmem:[%s6628_s1] sm:$0xff]  ;;  %v6011_v40 = vld [vmem:[%s6628_s1 + $0x18] sm:$0xff] }
 0x214   :  { %v2034_v60 = vmul.f32 %v2030_v22, %v1958_v1 }
 0x286   :  { %v4551_v20 = vpop.f32.mrb[0].mxu1 }
 0x287   :  { %v1809_v35 = vpop.f32.mrb[1].mxu1  ;;  %v2020_v0 = vmul.f32 %v4551_v20, %v2016_v19  ;;  %v2033_v19 = vmul.f32 %v2029_v47, %v1957_v2 }
 0x288   :  { %v2019_v14 = vmul.f32 %v2015_v56, %v1809_v35 }
 0x28a   :  { %v4554_v6 = vpop.f32.mrb[2].mxu1 }
 0x28b   :  { %v1821_v49 = vpop.f32.mrb[3].mxu1  ;;  %v2022_v39 = vmul.f32 %v4554_v6, %v2018_v11  ;;  %v5983_v6 = vld [vmem:[%s6628_s1 + $0x8] sm:$0xff] }
 0x28e   :  { %v4557_v43 = vpop.f32.mrb[4].mxu1 }
 0x28f   :  { %v1992_v30 = vadd.f32 %v4557_v43, %v1988_v18  ;;  %v1833_v8 = vpop.f32.mrb[5].mxu1  ;;  %v2021_v18 = vmul.f32 %v2017_v42, %v1821_v49 }
 0x290   :  { %v1991_v7 = vadd.f32 %v1987_v55, %v1833_v8 }
 0x291   :  { %v2012_v33 = vmul.f32 %v1992_v30, %v5661_v62 }
 0x292   :  { %v2011_v32 = vmul.f32 %v1991_v7, %v5661_v62  ;;  %v4560_v36 = vpop.f32.mrb[6].mxu1 }
 0x293   :  { %v2024_v13 = vadd.f32 %v2020_v0, %v2012_v33  ;;  %v1994_v38 = vadd.f32 %v4560_v36, %v1990_v59  ;;  %v1845_v29 = vpop.f32.mrb[7].mxu1  ;;  %v6022_v59 = vld [vmem:[%s6628_s1 + $0x10] sm:$0xff] }
 0x294   :  { %v2023_v20 = vadd.f32 %v2019_v14, %v2011_v32  ;;  %v1993_v34 = vadd.f32 %v1989_v31, %v1845_v29 }
 0x295   :  { %v5972_v35 = vadd.f32 %v2032_v61, %v2024_v13  ;;  %v2014_v45 = vmul.f32 %v1994_v38, %v5661_v62 }
 0x296   :  { %v5975_v55 = vadd.f32 %v2031_v53, %v2023_v20  ;;  %v2013_v50 = vmul.f32 %v1993_v34, %v5661_v62 }
 0x297   :  { %6718 = vst [vmem:[#allocation16_spill] sm:$0xff] %v5972_v35  ;;  %v2040_v43 = vmul.f32 0.25, %v5972_v35  ;;  %v2026_v46 = vadd.f32 %v2022_v39, %v2014_v45 }
 0x298   :  { %6719 = vst [vmem:[#allocation25_spill] sm:$0xff] %v5975_v55  ;;  %v2039_v56 = vmul.f32 0.25, %v5975_v55  ;;  %v2025_v30 = vadd.f32 %v2021_v18, %v2013_v50 }
 0x299   :  { %v5986_v10 = vadd.f32 %v5983_v6, %v2040_v43  ;;  %v5988_v49 = vadd.f32 %v2034_v60, %v2026_v46 }
 0x29a   :  { %v5996_v61 = vadd.f32 %v5993_v52, %v2039_v56  ;;  %v5998_v8 = vadd.f32 %v2033_v19, %v2025_v30  ;;  %v6722_v56 = vld [vmem:[#allocation10_spill] sm:$0xff] }
 0x29b   :  { %6720 = vst [vmem:[#allocation30_spill] sm:$0xff] %v5988_v49  ;;  %v2042_v48 = vmul.f32 0.25, %v5988_v49  ;;  %2835 = vrot.lane.b32.xlu1 %v5986_v10, %s5186_s5  ;;  %v2051_v5 = vand.u32 4294901760, %v5986_v10 }
 0x29c   :  { %6721 = vst [vmem:[#allocation31_spill] sm:$0xff] %v5998_v8  ;;  %v2041_v12 = vmul.f32 0.25, %v5998_v8  ;;  %2833 = vrot.lane.b32.xlu0 %v5996_v61, %s5186_s5  ;;  %v2048_v7 = vand.u32 4294901760, %v5996_v61 }
 0x29d   :  { %v6014_v0 = vadd.f32 %v6011_v40, %v2042_v48  ;;  %v6017_v33 = vsub.f32 %v5986_v10, %v2051_v5  ;;  %v6723_v48 = vld [vmem:[#allocation11_spill] sm:$0xff] }
 0x29e   :  { %v6025_v53 = vadd.f32 %v6022_v59, %v2041_v12  ;;  %v6027_v14 = vpack.c.bf16 %v2051_v5, %v2048_v7  ;;  %v6030_v32 = vsub.f32 %v5996_v61, %v2048_v7  ;;  %v6724_v5 = vld [vmem:[#allocation15_spill] sm:$0xff]  ;;  %v6725_v12 = vld [vmem:[#allocation20_spill] sm:$0xff]  ;;  %v6726_v7 = vld [vmem:[#allocation21_spill] sm:$0xff] }
 0x29f   :  { %2843 = vrot.lane.b32.xlu1 %v5986_v10, %s5187_s12  ;;  %v2057_v36 = vand.u32 4294901760, %v6014_v0  ;;  %v2206_v31 = vand.u32 4294901760, %v6017_v33 }
 0x2a0   :  { %2841 = vrot.lane.b32.xlu0 %v5996_v61, %s5187_s12  ;;  %4898 = vmatprep.subr.bf16.mxu0 %v6027_v14  ;;  %v2054_v22 = vand.u32 4294901760, %v6025_v53  ;;  %v2199_v11 = vand.u32 4294901760, %v6030_v32  ;;  %v4913_v46 = vpack.c.bf16 %v6017_v33, %v6030_v32 }
 0x2a1   :  { %4900 = vmatpush3.bf16.msra.mxu0 %v6027_v14  ;;  %v2207_v13 = vsub.f32 %v6017_v33, %v2206_v31  ;;  %v6046_v38 = vsub.f32 %v6014_v0, %v2057_v36  ;;  %v6727_v33 = vld [vmem:[#allocation8_spill] sm:$0xff] }
 0x2a2   :  { %v6048_v29 = vpack.c.bf16 %v2057_v36, %v2054_v22  ;;  %v2200_v47 = vsub.f32 %v6030_v32, %v2199_v11  ;;  %v6054_v42 = vsub.f32 %v6025_v53, %v2054_v22  ;;  %v4929_v30 = vpack.c.bf16 %v2206_v31, %v2199_v11  ;;  %v6728_v32 = vld [vmem:[#allocation9_spill] sm:$0xff]  ;;  %v6729_v31 = vld [vmem:[#allocation12_spill] sm:$0xff]  ;;  %v6731_v11 = vld [vmem:[#allocation14_spill] sm:$0xff] }
 0x2a3   :  { %2855 = vrot.lane.b32.xlu1 %v5986_v10, %s5188_s15  ;;  %v2208_v20 = vand.u32 4294901760, %v2207_v13  ;;  %v2220_v34 = vand.u32 4294901760, %v6046_v38  ;;  %v6730_v22 = vld [vmem:[#allocation13_spill] sm:$0xff] }
 0x2a4   :  { %2853 = vrot.lane.b32.xlu0 %v5996_v61, %s5188_s15  ;;  %4902 = vmatprep.subr.bf16.mxu0 %v6048_v29  ;;  %v2201_v1 = vand.u32 4294901760, %v2200_v47  ;;  %v2213_v39 = vand.u32 4294901760, %v6054_v42  ;;  %v4917_v19 = vpack.c.bf16 %v6046_v38, %v6054_v42  ;;  %v6732_v13 = vld [vmem:[#allocation17_spill] sm:$0xff]  ;;  %v6734_v47 = vld [vmem:[#allocation23_spill] sm:$0xff] }
 0x2a5   :  { %4904 = vmatpush3.bf16.msra.mxu0 %v6048_v29  ;;  %v2221_v45 = vsub.f32 %v6046_v38, %v2220_v34  ;;  %v6733_v38 = vld [vmem:[#allocation22_spill] sm:$0xff] }
 0x2a6   :  { %v4905_v2 = vpack.c.bf16 %v2208_v20, %v2201_v1  ;;  %v2214_v18 = vsub.f32 %v6054_v42, %v2213_v39  ;;  %v4933_v36 = vpack.c.bf16 %v2220_v34, %v2213_v39 }
 0x2a7   :  { %2863 = vrot.lane.b32.xlu1 %v5986_v10, %s5189_s2  ;;  %v2222_v50 = vand.u32 4294901760, %v2221_v45 }
 0x2a8   :  { %2861 = vrot.lane.b32.xlu0 %v5996_v61, %s5189_s2  ;;  %4570 = vmatmul.mubr.f32.vlgmr.msra.gmra.mrb[8].mxu0 %v5366_v51  ;;  %v2215_v60 = vand.u32 4294901760, %v2214_v18 }
 0x2a9   :  { %4906 = vmatprep.subr.bf16.mxu0 %v4905_v2  ;;  %4572 = vmatprep.mubr.f32.mxu0 %v5374_v54 }
 0x2aa   :  { %4908 = vmatpush3.bf16.msra.mxu0 %v4905_v2  ;;  %v4909_v43 = vpack.c.bf16 %v2222_v50, %v2215_v60 }
 0x2ab   :  { %2875 = vrot.lane.b32.xlu1 %v5986_v10, %s5190_s20 }
 0x2ac   :  { %2873 = vrot.lane.b32.xlu0 %v5996_v61, %s5190_s20  ;;  %4573 = vmatmul.mubr.f32.gmra.mrb[10].mxu0 %v5380_v58 }
 0x2ad   :  { %4910 = vmatprep.subr.bf16.mxu0 %v4909_v43  ;;  %4575 = vmatprep.mubr.f32.mxu0 %v5395_v4 }
 0x2ae   :  { %4912 = vmatpush3.bf16.msra.mxu0 %v4909_v43 }
 0x2af   :  { %4914 = vmatprep.subr.bf16.mxu0 %v4913_v46  ;;  %2883 = vrot.lane.b32.xlu1 %v5986_v10, %s5191_s21 }
 0x2b0   :  { %2881 = vrot.lane.b32.xlu0 %v5996_v61, %s5191_s21  ;;  %4576 = vmatmul.mubr.f32.gmra.mrb[12].mxu0 %v5420_v9 }
 0x2b1   :  { %4578 = vmatprep.mubr.f32.mxu0 %v5444_v41 }
 0x2b3   :  { %2895 = vrot.lane.b32.xlu1 %v5986_v10, %s5192_s22 }
 0x2b4   :  { %2893 = vrot.lane.b32.xlu0 %v5996_v61, %s5192_s22  ;;  %4579 = vmatmul.mubr.f32.gmra.mrb[14].mxu0 %v5446_v44 }
 0x2b5   :  { %4589 = vmatprep.mubr.f32.mxu0 %v5270_v16 }
 0x2b7   :  { %2903 = vrot.lane.b32.xlu1 %v5986_v10, %s5193_s0 }
 0x2b8   :  { %2901 = vrot.lane.b32.xlu0 %v5996_v61, %s5193_s0  ;;  %4590 = vmatmul.mubr.f32.vlgmr.msra.gmra.mrb[8].mxu0 %v5272_v17 }
 0x2b9   :  { %4916 = vmatpush3.bf16.msra.mxu0 %v4913_v46  ;;  %4592 = vmatprep.mubr.f32.mxu0 %v5284_v21 }
 0x2ba   :  { %4918 = vmatprep.subr.bf16.mxu0 %v4917_v19 }
 0x2bb   :  { %2839 = vrot.lane.b32.xlu1 %v6014_v0, %s5186_s5 }
 0x2bc   :  { %2837 = vrot.lane.b32.xlu0 %v6025_v53, %s5186_s5  ;;  %4593 = vmatmul.mubr.f32.gmra.mrb[10].mxu0 %v5295_v26 }
 0x2bd   :  { %4920 = vmatpush3.bf16.msra.mxu0 %v4917_v19  ;;  %4595 = vmatprep.mubr.f32.mxu0 %v5297_v27 }
 0x2be   :  { %4922 = vmatprep.subr.bf16.mxu0 %v6027_v14 }
 0x2bf   :  { %2847 = vrot.lane.b32.xlu1 %v6014_v0, %s5187_s12 }
 0x2c0   :  { %2845 = vrot.lane.b32.xlu0 %v6025_v53, %s5187_s12  ;;  %4596 = vmatmul.mubr.f32.gmra.mrb[12].mxu0 %v5330_v37 }
 0x2c1   :  { %4598 = vmatprep.mubr.f32.mxu0 %v5389_v63 }
 0x2c3   :  { %2859 = vrot.lane.b32.xlu1 %v6014_v0, %s5188_s15 }
 0x2c4   :  { %2857 = vrot.lane.b32.xlu0 %v6025_v53, %s5188_s15  ;;  %4599 = vmatmul.mubr.f32.gmra.mrb[14].mxu0 %v5391_v3 }
 0x2c5   :  { %4609 = vmatprep.mubr.f32.mxu0 %v5290_v24 }
 0x2c7   :  { %2867 = vrot.lane.b32.xlu1 %v6014_v0, %s5189_s2 }
 0x2c8   :  { %2865 = vrot.lane.b32.xlu0 %v6025_v53, %s5189_s2  ;;  %4610 = vmatmul.mubr.f32.vlgmr.msra.gmra.mrb[8].mxu0 %v5293_v25 }
 0x2c9   :  { %4924 = vmatpush3.bf16.msra.mxu0 %v6027_v14  ;;  %4612 = vmatprep.mubr.f32.mxu0 %v5303_v28 }
 0x2ca   :  { %4926 = vmatprep.subr.bf16.mxu0 %v6048_v29 }
 0x2cb   :  { %2879 = vrot.lane.b32.xlu1 %v6014_v0, %s5190_s20 }
 0x2cc   :  { %2877 = vrot.lane.b32.xlu0 %v6025_v53, %s5190_s20  ;;  %4613 = vmatmul.mubr.f32.gmra.mrb[10].mxu0 %v6722_v56 }
 0x2cd   :  { %4928 = vmatpush3.bf16.msra.mxu0 %v6048_v29  ;;  %4615 = vmatprep.mubr.f32.mxu0 %v6723_v48 }
 0x2ce   :  { %4930 = vmatprep.subr.bf16.mxu0 %v4929_v30 }
 0x2cf   :  { %2887 = vrot.lane.b32.xlu1 %v6014_v0, %s5191_s21 }
 0x2d0   :  { %2885 = vrot.lane.b32.xlu0 %v6025_v53, %s5191_s21  ;;  %4616 = vmatmul.mubr.f32.gmra.mrb[12].mxu0 %v6724_v5 }
 0x2d1   :  { %4618 = vmatprep.mubr.f32.mxu0 %v6725_v12 }
 0x2d3   :  { %2899 = vrot.lane.b32.xlu1 %v6014_v0, %s5192_s22 }
 0x2d4   :  { %2897 = vrot.lane.b32.xlu0 %v6025_v53, %s5192_s22  ;;  %4619 = vmatmul.mubr.f32.gmra.mrb[14].mxu0 %v6726_v7 }
 0x2d5   :  { %4629 = vmatprep.mubr.f32.mxu0 %v6727_v33 }
 0x2d7   :  { %2907 = vrot.lane.b32.xlu1 %v6014_v0, %s5193_s0 }
 0x2d8   :  { %2905 = vrot.lane.b32.xlu0 %v6025_v53, %s5193_s0  ;;  %4630 = vmatmul.mubr.f32.vlgmr.msra.gmra.mrb[8].mxu0 %v6728_v32 }
 0x2d9   :  { %4932 = vmatpush3.bf16.msra.mxu0 %v4929_v30  ;;  %4632 = vmatprep.mubr.f32.mxu0 %v6729_v31 }
 0x2da   :  { %4934 = vmatprep.subr.bf16.mxu0 %v4933_v36 }
 0x2db   :  { %2975 = vrot.lane.b32.xlu1 %v5986_v10, %s5194_s23 }
 0x2dc   :  { %2973 = vrot.lane.b32.xlu0 %v5996_v61, %s5194_s23  ;;  %4633 = vmatmul.mubr.f32.gmra.mrb[10].mxu0 %v6730_v22 }
 0x2dd   :  { %4936 = vmatpush3.bf16.msra.mxu0 %v4933_v36  ;;  %4635 = vmatprep.mubr.f32.mxu0 %v6731_v11 }
 0x2de   :  { %4938 = vmatprep.subr.bf16.mxu0 %v6027_v14 }
 0x2df   :  { %2979 = vrot.lane.b32.xlu1 %v6014_v0, %s5194_s23 }
 0x2e0   :  { %2977 = vrot.lane.b32.xlu0 %v6025_v53, %s5194_s23  ;;  %4636 = vmatmul.mubr.f32.gmra.mrb[12].mxu0 %v6732_v13 }
 0x2e1   :  { %4638 = vmatprep.mubr.f32.mxu0 %v6733_v38 }
 0x2e4   :  { %4639 = vmatmul.mubr.f32.gmra.mrb[14].mxu0 %v6734_v47 }
 0x2e5   :  { %4649 = vmatprep.mubr.f32.mxu0 %v5270_v16 }
 0x2e8   :  { %4650 = vmatmul.mubr.f32.vlgmr.msra.gmra.mrb[8].mxu0 %v5272_v17 }
 0x2e9   :  { %4940 = vmatpush3.bf16.msra.mxu0 %v6027_v14  ;;  %4652 = vmatprep.mubr.f32.mxu0 %v5284_v21 }
 0x2ea   :  { %4942 = vmatprep.subr.bf16.mxu0 %v6048_v29 }
 0x2ec   :  { %4653 = vmatmul.mubr.f32.gmra.mrb[10].mxu0 %v5295_v26 }
 0x2ed   :  { %4944 = vmatpush3.bf16.msra.mxu0 %v6048_v29  ;;  %4655 = vmatprep.mubr.f32.mxu0 %v5297_v27 }
 0x2f0   :  { %4656 = vmatmul.mubr.f32.gmra.mrb[12].mxu0 %v5330_v37 }
 0x2f1   :  { %4658 = vmatprep.mubr.f32.mxu0 %v5389_v63 }
 0x2f4   :  { %4659 = vmatmul.mubr.f32.gmra.mrb[14].mxu0 %v5391_v3 }
 0x2f5   :  { %4669 = vmatprep.mubr.f32.mxu0 %v5270_v16 }
 0x2f8   :  { %4670 = vmatmul.mubr.f32.vlgmr.msra.gmra.mrb[8].mxu0 %v5272_v17 }
 0x2f9   :  { %4672 = vmatprep.mubr.f32.mxu0 %v5284_v21 }
 0x2fc   :  { %4673 = vmatmul.mubr.f32.gmra.mrb[10].mxu0 %v5295_v26 }
 0x2fd   :  { %4675 = vmatprep.mubr.f32.mxu0 %v5297_v27 }
 0x300   :  { %4676 = vmatmul.mubr.f32.gmra.mrb[12].mxu0 %v5330_v37 }
 0x301   :  { %4678 = vmatprep.mubr.f32.mxu0 %v5389_v63 }
 0x304   :  { %4679 = vmatmul.mubr.f32.gmra.mrb[14].mxu0 %v5391_v3 }
 0x30d   :  { %v2836_v14 = vpop.permute.xlu1 %2835 }
 0x30e   :  { %v2834_v29 = vpop.permute.xlu0 %2833 }
 0x311   :  { %v2844_v42 = vpop.permute.xlu1 %2843 }
 0x312   :  { %v2842_v20 = vpop.permute.xlu0 %2841  ;;  %v2850_v56 = vsel %vm51_vm1, %v2844_v42, %v2836_v14 }
 0x313   :  { %v2849_v28 = vsel %vm51_vm1, %v2842_v20, %v2834_v29  ;;  %v2914_v42 = vmul.f32 8.0, %v2850_v56 }
 0x314   :  { %v2913_v20 = vmul.f32 8.0, %v2849_v28 }
 0x315   :  { %v2856_v34 = vpop.permute.xlu1 %2855 }
 0x316   :  { %v2854_v1 = vpop.permute.xlu0 %2853 }
 0x319   :  { %v2864_v39 = vpop.permute.xlu1 %2863 }
 0x31a   :  { %v2862_v45 = vpop.permute.xlu0 %2861  ;;  %v2870_v25 = vsel %vm52_vm3, %v2864_v39, %v2856_v34 }
 0x31b   :  { %v2869_v3 = vsel %vm52_vm3, %v2862_v45, %v2854_v1 }
 0x31d   :  { %v2876_v2 = vpop.permute.xlu1 %2875 }
 0x31e   :  { %v2874_v18 = vpop.permute.xlu0 %2873 }
 0x321   :  { %v2884_v50 = vpop.permute.xlu1 %2883 }
 0x322   :  { %v2882_v60 = vpop.permute.xlu0 %2881 }
 0x325   :  { %v2896_v43 = vpop.permute.xlu1 %2895 }
 0x326   :  { %v2894_v46 = vpop.permute.xlu0 %2893 }
 0x329   :  { %v2904_v19 = vpop.permute.xlu1 %2903 }
 0x32a   :  { %v2902_v30 = vpop.permute.xlu0 %2901  ;;  %v6199_v5 = vsel %vm54_vm4, %v2904_v19, %v2896_v43  ;;  %v2890_v43 = vsel %vm53_vm2, %v2884_v50, %v2876_v2 }
 0x32b   :  { %v6203_v48 = vsel %vm54_vm4, %v2902_v30, %v2894_v46  ;;  %v2889_v46 = vsel %vm53_vm2, %v2882_v60, %v2874_v18  ;;  %v2938_v19 = vadd.f32 %v6199_v5, %v2870_v25  ;;  %v2946_v34 = vadd.f32 %v2890_v43, %v2850_v56 }
 0x32c   :  { %v2937_v14 = vadd.f32 %v6203_v48, %v2869_v3  ;;  %v2945_v39 = vadd.f32 %v2889_v46, %v2849_v28  ;;  %v2922_v45 = vmul.f32 8.0, %v2890_v43 }
 0x32d   :  { %v2840_v36 = vpop.permute.xlu1 %2839  ;;  %v2942_v2 = vmul.f32 -0.083333336, %v2938_v19 }
 0x32e   :  { %v2838_v8 = vpop.permute.xlu0 %2837  ;;  %v2941_v60 = vmul.f32 -0.083333336, %v2937_v14 }
 0x331   :  { %v2848_v49 = vpop.permute.xlu1 %2847 }
 0x332   :  { %v2846_v55 = vpop.permute.xlu0 %2845  ;;  %v2852_v43 = vsel %vm51_vm1, %v2848_v49, %v2840_v36  ;;  %v2958_v49 = vmul.f32 2.5, %v5986_v10  ;;  %v2957_v36 = vmul.f32 2.5, %v5996_v61 }
 0x335   :  { %v2860_v35 = vpop.permute.xlu1 %2859 }
 0x336   :  { %v2858_v47 = vpop.permute.xlu0 %2857 }
 0x339   :  { %v2868_v38 = vpop.permute.xlu1 %2867 }
 0x33a   :  { %v2866_v13 = vpop.permute.xlu0 %2865  ;;  %v2872_v18 = vsel %vm52_vm3, %v2868_v38, %v2860_v35  ;;  %v2950_v35 = vmul.f32 1.3333334, %v2946_v34  ;;  %v2949_v38 = vmul.f32 1.3333334, %v2945_v39  ;;  %v2916_v39 = vmul.f32 8.0, %v2852_v43 }
 0x33c   :  { %v2953_v63 = vadd.f32 %v2949_v38, %v2941_v60 }
 0x33d   :  { %v2880_v11 = vpop.permute.xlu1 %2879 }
 0x33e   :  { %v2878_v22 = vpop.permute.xlu0 %2877 }
 0x341   :  { %v2888_v31 = vpop.permute.xlu1 %2887 }
 0x342   :  { %v2886_v32 = vpop.permute.xlu0 %2885  ;;  %v2892_v50 = vsel %vm53_vm2, %v2888_v31, %v2880_v11  ;;  %v2851_v31 = vsel %vm51_vm1, %v2846_v55, %v2838_v8 }
 0x343   :  { %v2891_v56 = vsel %vm53_vm2, %v2886_v32, %v2878_v22  ;;  %v2948_v11 = vadd.f32 %v2892_v50, %v2852_v43  ;;  %v2954_v22 = vadd.f32 %v2950_v35, %v2942_v2  ;;  %v2915_v12 = vmul.f32 8.0, %v2851_v31 }
 0x344   :  { %v2920_v35 = vsub.f32 %v2872_v18, %v2916_v39  ;;  %v2960_v43 = vmul.f32 2.5, %v6014_v0 }
 0x345   :  { %v2900_v33 = vpop.permute.xlu1 %2899  ;;  %v2952_v55 = vmul.f32 1.3333334, %v2948_v11 }
 0x346   :  { %v2898_v7 = vpop.permute.xlu0 %2897 }
 0x349   :  { %v2908_v24 = vpop.permute.xlu1 %2907 }
 0x34a   :  { %v2906_v30 = vpop.permute.xlu0 %2905  ;;  %v6221_v29 = vsel %vm54_vm4, %v2908_v24, %v2900_v33  ;;  %v2871_v24 = vsel %vm52_vm3, %v2866_v13, %v2858_v47  ;;  %v2918_v33 = vsub.f32 %v2870_v25, %v2914_v42  ;;  %v2947_v13 = vadd.f32 %v2891_v56, %v2851_v31 }
 0x34b   :  { %v6225_v1 = vsel %vm54_vm4, %v2906_v30, %v2898_v7  ;;  %v2940_v28 = vadd.f32 %v6221_v29, %v2872_v18  ;;  %v2921_v7 = vmul.f32 8.0, %v2889_v46  ;;  %v2917_v30 = vsub.f32 %v2869_v3, %v2913_v20 }
 0x34c   :  { %v2939_v19 = vadd.f32 %v6225_v1, %v2871_v24  ;;  %v2926_v47 = vadd.f32 %v2922_v45, %v2918_v33  ;;  %v2924_v20 = vmul.f32 8.0, %v2892_v50  ;;  %v2923_v45 = vmul.f32 8.0, %v2891_v56 }
 0x34d   :  { %v2944_v14 = vmul.f32 -0.083333336, %v2940_v28  ;;  %v2976_v32 = vpop.permute.xlu1 %2975  ;;  %v2925_v25 = vadd.f32 %v2921_v7, %v2917_v30  ;;  %v2951_v28 = vmul.f32 1.3333334, %v2947_v13  ;;  %v2962_v33 = vsub.f32 %v2954_v22, %v2958_v49 }
 0x34e   :  { %v2943_v46 = vmul.f32 -0.083333336, %v2939_v19  ;;  %v2930_v34 = vsub.f32 %v2926_v47, %v6199_v5  ;;  %v2974_v8 = vpop.permute.xlu0 %2973  ;;  %v2986_v2 = vsel %vm50_vm5, %v2976_v32, %v5986_v10  ;;  %v2961_v7 = vsub.f32 %v2953_v63, %v2957_v36 }
 0x34f   :  { %v2929_v60 = vsub.f32 %v2925_v25, %v6203_v48  ;;  %v2956_v19 = vadd.f32 %v2952_v55, %v2944_v14  ;;  %v2919_v38 = vsub.f32 %v2871_v24, %v2915_v12  ;;  %v3006_v50 = vmul.f32 %v2986_v2, %v5643_v15 }
 0x350   :  { %v2955_v31 = vadd.f32 %v2951_v28, %v2943_v46  ;;  %v2934_v11 = vmul.f32 8.333333, %v2930_v34  ;;  %v2985_v56 = vsel %vm50_vm5, %v2974_v8, %v5996_v61  ;;  %v2959_v13 = vmul.f32 2.5, %v6025_v53 }
 0x351   :  { %v2928_v48 = vadd.f32 %v2924_v20, %v2920_v35  ;;  %v2927_v47 = vadd.f32 %v2923_v45, %v2919_v38  ;;  %v2982_v63 = vsel %vm50_vm5, %v5986_v10, %v2976_v32  ;;  %v2981_v12 = vsel %vm50_vm5, %v5996_v61, %v2974_v8  ;;  %v2980_v24 = vpop.permute.xlu1 %2979 }
 0x352   :  { %v2933_v18 = vmul.f32 8.333333, %v2929_v60  ;;  %v2978_v14 = vpop.permute.xlu0 %2977  ;;  %v2966_v22 = vmul.f32 10000.0, %v2962_v33  ;;  %v2965_v25 = vmul.f32 10000.0, %v2961_v7  ;;  %v2964_v46 = vsub.f32 %v2956_v19, %v2960_v43 }
 0x353   :  { %v2932_v49 = vsub.f32 %v2928_v48, %v6221_v29  ;;  %v2931_v36 = vsub.f32 %v2927_v47, %v6225_v1  ;;  %v3005_v34 = vmul.f32 %v2985_v56, %v5643_v15  ;;  %v2963_v55 = vsub.f32 %v2955_v31, %v2959_v13 }
 0x354   :  { %v3010_v20 = vmul.f32 %v3006_v50, %v2934_v11  ;;  %v2994_v10 = vmul.f32 %v2982_v63, %v5635_v23  ;;  %v2993_v32 = vmul.f32 %v2981_v12, %v5635_v23  ;;  %v2984_v45 = vsel %vm50_vm5, %v6014_v0, %v2980_v24 }
 0x355   :  { %v2988_v29 = vsel %vm50_vm5, %v2980_v24, %v6014_v0  ;;  %v2983_v1 = vsel %vm50_vm5, %v6025_v53, %v2978_v14  ;;  %v2987_v2 = vsel %vm50_vm5, %v2978_v14, %v6025_v53  ;;  %v2968_v7 = vmul.f32 10000.0, %v2964_v46 }
 0x356   :  { %v3009_v19 = vmul.f32 %v3005_v34, %v2933_v18  ;;  %v2967_v31 = vmul.f32 10000.0, %v2963_v55  ;;  %v3008_v0 = vmul.f32 %v2988_v29, %v5643_v15  ;;  %v2996_v11 = vmul.f32 %v2984_v45, %v5635_v23 }
 0x357   :  { %v3007_v48 = vmul.f32 %v2987_v2, %v5643_v15  ;;  %v2995_v53 = vmul.f32 %v2983_v1, %v5635_v23  ;;  %v2936_v63 = vmul.f32 8.333333, %v2932_v49  ;;  %v2935_v24 = vmul.f32 8.333333, %v2931_v36 }
 0x359   :  { %v3012_v46 = vmul.f32 %v3008_v0, %v2936_v63  ;;  %v3011_v55 = vmul.f32 %v3007_v48, %v2935_v24  ;;  %v6744_v24 = vld [vmem:[#allocation20_spill] sm:$0xff] }
 0x3cb   :  { %v4671_v42 = vpop.f32.mrb[8].mxu0 }
 0x3cc   :  { %v2787_v3 = vpop.f32.mrb[9].mxu0  ;;  %v2998_v60 = vmul.f32 %v4671_v42, %v2994_v10 }
 0x3cd   :  { %v2997_v35 = vmul.f32 %v2993_v32, %v2787_v3 }
 0x3cf   :  { %v4674_v5 = vpop.f32.mrb[10].mxu0 }
 0x3d0   :  { %v2799_v30 = vpop.f32.mrb[11].mxu0  ;;  %v3000_v12 = vmul.f32 %v4674_v5, %v2996_v11 }
 0x3d1   :  { %v2999_v14 = vmul.f32 %v2995_v53, %v2799_v30 }
 0x3d3   :  { %v4677_v39 = vpop.f32.mrb[12].mxu0 }
 0x3d4   :  { %v2970_v61 = vadd.f32 %v4677_v39, %v2966_v22  ;;  %v2811_v8 = vpop.f32.mrb[13].mxu0 }
 0x3d5   :  { %v2969_v28 = vadd.f32 %v2965_v25, %v2811_v8 }
 0x3d6   :  { %v2990_v33 = vmul.f32 %v2970_v61, %v5661_v62 }
 0x3d7   :  { %v2989_v38 = vmul.f32 %v2969_v28, %v5661_v62  ;;  %v4680_v43 = vpop.f32.mrb[14].mxu0 }
 0x3d8   :  { %v3002_v50 = vadd.f32 %v2998_v60, %v2990_v33  ;;  %v2972_v56 = vadd.f32 %v4680_v43, %v2968_v7  ;;  %v2823_v13 = vpop.f32.mrb[15].mxu0 }
 0x3d9   :  { %v3001_v42 = vadd.f32 %v2997_v35, %v2989_v38  ;;  %v2971_v47 = vadd.f32 %v2967_v31, %v2823_v13 }
 0x3da   :  { %v6283_v3 = vadd.f32 %v3010_v20, %v3002_v50  ;;  %v2992_v18 = vmul.f32 %v2972_v56, %v5661_v62 }
 0x3db   :  { %v6286_v22 = vadd.f32 %v3009_v19, %v3001_v42  ;;  %v2991_v25 = vmul.f32 %v2971_v47, %v5661_v62 }
 0x3dc   :  { %v3018_v34 = vmul.f32 0.5, %v6283_v3  ;;  %v3004_v39 = vadd.f32 %v3000_v12, %v2992_v18  ;;  %v6742_v12 = vld [vmem:[#allocation11_spill] sm:$0xff] }
 0x3dd   :  { %v3017_v10 = vmul.f32 0.5, %v6286_v22  ;;  %v3003_v32 = vadd.f32 %v2999_v14, %v2991_v25  ;;  %v6743_v18 = vld [vmem:[#allocation15_spill] sm:$0xff]  ;;  %v6745_v14 = vld [vmem:[#allocation21_spill] sm:$0xff]  ;;  %v6746_v25 = vld [vmem:[#allocation8_spill] sm:$0xff] }
 0x3de   :  { %v6292_v5 = vadd.f32 %v5983_v6, %v3018_v34  ;;  %v6294_v49 = vadd.f32 %v3012_v46, %v3004_v39  ;;  %v6747_v46 = vld [vmem:[#allocation9_spill] sm:$0xff]  ;;  %v6748_v39 = vld [vmem:[#allocation12_spill] sm:$0xff] }
 0x3df   :  { %v6297_v36 = vadd.f32 %v5993_v52, %v3017_v10  ;;  %v6299_v30 = vadd.f32 %v3011_v55, %v3003_v32  ;;  %v6749_v55 = vld [vmem:[#allocation13_spill] sm:$0xff]  ;;  %v6750_v10 = vld [vmem:[#allocation14_spill] sm:$0xff] }
 0x3e0   :  { %v3020_v20 = vmul.f32 0.5, %v6294_v49  ;;  %3813 = vrot.lane.b32.xlu1 %v6292_v5, %s5186_s5  ;;  %v3029_v61 = vand.u32 4294901760, %v6292_v5  ;;  %v6751_v32 = vld [vmem:[#allocation17_spill] sm:$0xff] }
 0x3e1   :  { %v3019_v8 = vmul.f32 0.5, %v6299_v30  ;;  %3811 = vrot.lane.b32.xlu0 %v6297_v36, %s5186_s5  ;;  %v3026_v6 = vand.u32 4294901760, %v6297_v36 }
 0x3e2   :  { %v6310_v45 = vadd.f32 %v6011_v40, %v3020_v20  ;;  %v6313_v52 = vsub.f32 %v6292_v5, %v3029_v61  ;;  %v6752_v20 = vld [vmem:[#allocation22_spill] sm:$0xff] }
 0x3e3   :  { %v6316_v29 = vadd.f32 %v6022_v59, %v3019_v8  ;;  %v6318_v1 = vpack.c.bf16 %v3029_v61, %v3026_v6  ;;  %v6321_v28 = vsub.f32 %v6297_v36, %v3026_v6  ;;  %v6753_v61 = vld [vmem:[#allocation23_spill] sm:$0xff] }
 0x3e4   :  { %3821 = vrot.lane.b32.xlu1 %v6292_v5, %s5187_s12  ;;  %v3035_v2 = vand.u32 4294901760, %v6310_v45  ;;  %v3184_v60 = vand.u32 4294901760, %v6313_v52 }
 0x3e5   :  { %3819 = vrot.lane.b32.xlu0 %v6297_v36, %s5187_s12  ;;  %4946 = vmatprep.subr.bf16.mxu1 %v6318_v1  ;;  %v3032_v40 = vand.u32 4294901760, %v6316_v29  ;;  %v3177_v59 = vand.u32 4294901760, %v6321_v28  ;;  %v4961_v47 = vpack.c.bf16 %v6313_v52, %v6321_v28 }
 0x3e6   :  { %4948 = vmatpush3.bf16.msra.mxu1 %v6318_v1  ;;  %v3185_v33 = vsub.f32 %v6313_v52, %v3184_v60  ;;  %v6337_v7 = vsub.f32 %v6310_v45, %v3035_v2 }
 0x3e7   :  { %v6339_v19 = vpack.c.bf16 %v3035_v2, %v3032_v40  ;;  %v3178_v35 = vsub.f32 %v6321_v28, %v3177_v59  ;;  %v6345_v38 = vsub.f32 %v6316_v29, %v3032_v40  ;;  %v4977_v63 = vpack.c.bf16 %v3184_v60, %v3177_v59 }
 0x3e8   :  { %3833 = vrot.lane.b32.xlu1 %v6292_v5, %s5188_s15  ;;  %v3186_v43 = vand.u32 4294901760, %v3185_v33  ;;  %v3198_v31 = vand.u32 4294901760, %v6337_v7 }
 0x3e9   :  { %3831 = vrot.lane.b32.xlu0 %v6297_v36, %s5188_s15  ;;  %4950 = vmatprep.subr.bf16.mxu1 %v6339_v19  ;;  %v3179_v0 = vand.u32 4294901760, %v3178_v35  ;;  %v3191_v11 = vand.u32 4294901760, %v6345_v38 }
 0x3ea   :  { %4952 = vmatpush3.bf16.msra.mxu1 %v6339_v19  ;;  %v3199_v50 = vsub.f32 %v6337_v7, %v3198_v31 }
 0x3eb   :  { %v4953_v56 = vpack.c.bf16 %v3186_v43, %v3179_v0  ;;  %v3192_v13 = vsub.f32 %v6345_v38, %v3191_v11  ;;  %v4981_v34 = vpack.c.bf16 %v3198_v31, %v3191_v11 }
 0x3ec   :  { %3841 = vrot.lane.b32.xlu1 %v6292_v5, %s5189_s2  ;;  %v3200_v48 = vand.u32 4294901760, %v3199_v50 }
 0x3ed   :  { %3839 = vrot.lane.b32.xlu0 %v6297_v36, %s5189_s2  ;;  %4690 = vmatmul.mubr.f32.vlgmr.msra.gmra.mrb[8].mxu1 %v5366_v51  ;;  %v3193_v53 = vand.u32 4294901760, %v3192_v13  ;;  %v4965_v51 = vpack.c.bf16 %v6337_v7, %v6345_v38 }
 0x3ee   :  { %4954 = vmatprep.subr.bf16.mxu1 %v4953_v56  ;;  %4692 = vmatprep.mubr.f32.mxu1 %v5374_v54  ;;  %v6736_v54 = vld [vmem:[#allocation18_spill] sm:$0xff] }
 0x3ef   :  { %4956 = vmatpush3.bf16.msra.mxu1 %v4953_v56  ;;  %v4957_v42 = vpack.c.bf16 %v3200_v48, %v3193_v53 }
 0x3f0   :  { %3853 = vrot.lane.b32.xlu1 %v6292_v5, %s5190_s20 }
 0x3f1   :  { %3851 = vrot.lane.b32.xlu0 %v6297_v36, %s5190_s20  ;;  %4693 = vmatmul.mubr.f32.gmra.mrb[10].mxu1 %v5380_v58  ;;  %v6737_v58 = vld [vmem:[#allocation19_spill] sm:$0xff] }
 0x3f2   :  { %4958 = vmatprep.subr.bf16.mxu1 %v4957_v42  ;;  %4695 = vmatprep.mubr.f32.mxu1 %v5395_v4  ;;  %v6738_v4 = vld [vmem:[#allocation5_spill] sm:$0xff] }
 0x3f3   :  { %4960 = vmatpush3.bf16.msra.mxu1 %v4957_v42  ;;  %v6754_v42 = vld [vmem:[#allocation16_spill] sm:$0xff] }
 0x3f4   :  { %4962 = vmatprep.subr.bf16.mxu1 %v4961_v47  ;;  %3861 = vrot.lane.b32.xlu1 %v6292_v5, %s5191_s21 }
 0x3f5   :  { %3859 = vrot.lane.b32.xlu0 %v6297_v36, %s5191_s21  ;;  %4696 = vmatmul.mubr.f32.gmra.mrb[12].mxu1 %v5420_v9  ;;  %v6739_v9 = vld [vmem:[#allocation6_spill] sm:$0xff] }
 0x3f6   :  { %4698 = vmatprep.mubr.f32.mxu1 %v5444_v41  ;;  %v6740_v41 = vld [vmem:[#allocation7_spill] sm:$0xff] }
 0x3f8   :  { %3873 = vrot.lane.b32.xlu1 %v6292_v5, %s5192_s22 }
 0x3f9   :  { %3871 = vrot.lane.b32.xlu0 %v6297_v36, %s5192_s22  ;;  %4699 = vmatmul.mubr.f32.gmra.mrb[14].mxu1 %v5446_v44  ;;  %v6741_v44 = vld [vmem:[#allocation10_spill] sm:$0xff] }
 0x3fa   :  { %4709 = vmatprep.mubr.f32.mxu1 %v5270_v16 }
 0x3fc   :  { %3881 = vrot.lane.b32.xlu1 %v6292_v5, %s5193_s0 }
 0x3fd   :  { %3879 = vrot.lane.b32.xlu0 %v6297_v36, %s5193_s0  ;;  %4710 = vmatmul.mubr.f32.vlgmr.msra.gmra.mrb[8].mxu1 %v5272_v17 }
 0x3fe   :  { %4964 = vmatpush3.bf16.msra.mxu1 %v4961_v47  ;;  %4712 = vmatprep.mubr.f32.mxu1 %v5284_v21  ;;  %v3996_v47 = vadd.f32 %v6283_v3, %v6754_v42 }
 0x3ff   :  { %4966 = vmatprep.subr.bf16.mxu1 %v4965_v51 }
 0x400   :  { %3817 = vrot.lane.b32.xlu1 %v6310_v45, %s5186_s5 }
 0x401   :  { %3815 = vrot.lane.b32.xlu0 %v6316_v29, %s5186_s5  ;;  %4713 = vmatmul.mubr.f32.gmra.mrb[10].mxu1 %v5295_v26 }
 0x402   :  { %4968 = vmatpush3.bf16.msra.mxu1 %v4965_v51  ;;  %4715 = vmatprep.mubr.f32.mxu1 %v5297_v27 }
 0x403   :  { %4970 = vmatprep.subr.bf16.mxu1 %v6318_v1 }
 0x404   :  { %3825 = vrot.lane.b32.xlu1 %v6310_v45, %s5187_s12 }
 0x405   :  { %3823 = vrot.lane.b32.xlu0 %v6316_v29, %s5187_s12  ;;  %4716 = vmatmul.mubr.f32.gmra.mrb[12].mxu1 %v5330_v37 }
 0x406   :  { %4718 = vmatprep.mubr.f32.mxu1 %v6736_v54 }
 0x408   :  { %3837 = vrot.lane.b32.xlu1 %v6310_v45, %s5188_s15 }
 0x409   :  { %3835 = vrot.lane.b32.xlu0 %v6316_v29, %s5188_s15  ;;  %4719 = vmatmul.mubr.f32.gmra.mrb[14].mxu1 %v6737_v58 }
 0x40a   :  { %4729 = vmatprep.mubr.f32.mxu1 %v6738_v4 }
 0x40c   :  { %3845 = vrot.lane.b32.xlu1 %v6310_v45, %s5189_s2 }
 0x40d   :  { %3843 = vrot.lane.b32.xlu0 %v6316_v29, %s5189_s2  ;;  %4730 = vmatmul.mubr.f32.vlgmr.msra.gmra.mrb[8].mxu1 %v6739_v9 }
 0x40e   :  { %4972 = vmatpush3.bf16.msra.mxu1 %v6318_v1  ;;  %4732 = vmatprep.mubr.f32.mxu1 %v6740_v41  ;;  %v4000_v41 = vmul.f32 2.0, %v3996_v47 }
 0x40f   :  { %4974 = vmatprep.subr.bf16.mxu1 %v6339_v19 }
 0x410   :  { %3857 = vrot.lane.b32.xlu1 %v6310_v45, %s5190_s20 }
 0x411   :  { %3855 = vrot.lane.b32.xlu0 %v6316_v29, %s5190_s20  ;;  %4733 = vmatmul.mubr.f32.gmra.mrb[10].mxu1 %v6741_v44 }
 0x412   :  { %4976 = vmatpush3.bf16.msra.mxu1 %v6339_v19  ;;  %4735 = vmatprep.mubr.f32.mxu1 %v6742_v12 }
 0x413   :  { %4978 = vmatprep.subr.bf16.mxu1 %v4977_v63 }
 0x414   :  { %3865 = vrot.lane.b32.xlu1 %v6310_v45, %s5191_s21 }
 0x415   :  { %3863 = vrot.lane.b32.xlu0 %v6316_v29, %s5191_s21  ;;  %4736 = vmatmul.mubr.f32.gmra.mrb[12].mxu1 %v6743_v18 }
 0x416   :  { %4738 = vmatprep.mubr.f32.mxu1 %v6744_v24 }
 0x418   :  { %3877 = vrot.lane.b32.xlu1 %v6310_v45, %s5192_s22 }
 0x419   :  { %3875 = vrot.lane.b32.xlu0 %v6316_v29, %s5192_s22  ;;  %4739 = vmatmul.mubr.f32.gmra.mrb[14].mxu1 %v6745_v14 }
 0x41a   :  { %4749 = vmatprep.mubr.f32.mxu1 %v6746_v25 }
 0x41c   :  { %3885 = vrot.lane.b32.xlu1 %v6310_v45, %s5193_s0 }
 0x41d   :  { %3883 = vrot.lane.b32.xlu0 %v6316_v29, %s5193_s0  ;;  %4750 = vmatmul.mubr.f32.vlgmr.msra.gmra.mrb[8].mxu1 %v6747_v46 }
 0x41e   :  { %4980 = vmatpush3.bf16.msra.mxu1 %v4977_v63  ;;  %4752 = vmatprep.mubr.f32.mxu1 %v6748_v39  ;;  %v6757_v39 = vld [vmem:[#allocation30_spill] sm:$0xff] }
 0x41f   :  { %4982 = vmatprep.subr.bf16.mxu1 %v4981_v34 }
 0x420   :  { %3953 = vrot.lane.b32.xlu1 %v6292_v5, %s5194_s23 }
 0x421   :  { %3951 = vrot.lane.b32.xlu0 %v6297_v36, %s5194_s23  ;;  %4753 = vmatmul.mubr.f32.gmra.mrb[10].mxu1 %v6749_v55  ;;  %v3998_v55 = vadd.f32 %v6294_v49, %v6757_v39 }
 0x422   :  { %4984 = vmatpush3.bf16.msra.mxu1 %v4981_v34  ;;  %4755 = vmatprep.mubr.f32.mxu1 %v6750_v10 }
 0x423   :  { %4986 = vmatprep.subr.bf16.mxu1 %v6318_v1  ;;  %v6546_v47 = vmul.f32 2.0, %v3998_v55 }
 0x424   :  { %3957 = vrot.lane.b32.xlu1 %v6310_v45, %s5194_s23 }
 0x425   :  { %3955 = vrot.lane.b32.xlu0 %v6316_v29, %s5194_s23  ;;  %4756 = vmatmul.mubr.f32.gmra.mrb[12].mxu1 %v6751_v32  ;;  %v6517_v32 = vmul.f32 2.5, %v6292_v5 }
 0x426   :  { %4758 = vmatprep.mubr.f32.mxu1 %v6752_v20  ;;  %v6758_v20 = vld [vmem:[#allocation31_spill] sm:$0xff] }
 0x429   :  { %4759 = vmatmul.mubr.f32.gmra.mrb[14].mxu1 %v6753_v61  ;;  %v3997_v61 = vadd.f32 %v6299_v30, %v6758_v20 }
 0x42a   :  { %4769 = vmatprep.mubr.f32.mxu1 %v5270_v16 }
 0x42d   :  { %4770 = vmatmul.mubr.f32.vlgmr.msra.gmra.mrb[8].mxu1 %v5272_v17 }
 0x42e   :  { %4988 = vmatpush3.bf16.msra.mxu1 %v6318_v1  ;;  %4772 = vmatprep.mubr.f32.mxu1 %v5284_v21 }
 0x42f   :  { %4990 = vmatprep.subr.bf16.mxu1 %v6339_v19 }
 0x431   :  { %4773 = vmatmul.mubr.f32.gmra.mrb[10].mxu1 %v5295_v26 }
 0x432   :  { %4992 = vmatpush3.bf16.msra.mxu1 %v6339_v19  ;;  %4775 = vmatprep.mubr.f32.mxu1 %v5297_v27 }
 0x435   :  { %4776 = vmatmul.mubr.f32.gmra.mrb[12].mxu1 %v5330_v37 }
 0x436   :  { %4778 = vmatprep.mubr.f32.mxu1 %v6736_v54 }
 0x439   :  { %4779 = vmatmul.mubr.f32.gmra.mrb[14].mxu1 %v6737_v58 }
 0x43a   :  { %4789 = vmatprep.mubr.f32.mxu1 %v5270_v16 }
 0x43d   :  { %4790 = vmatmul.mubr.f32.vlgmr.msra.gmra.mrb[8].mxu1 %v5272_v17 }
 0x43e   :  { %4792 = vmatprep.mubr.f32.mxu1 %v5284_v21 }
 0x441   :  { %4793 = vmatmul.mubr.f32.gmra.mrb[10].mxu1 %v5295_v26 }
 0x442   :  { %4795 = vmatprep.mubr.f32.mxu1 %v5297_v27 }
 0x445   :  { %4796 = vmatmul.mubr.f32.gmra.mrb[12].mxu1 %v5330_v37 }
 0x446   :  { %4798 = vmatprep.mubr.f32.mxu1 %v6736_v54  ;;  %v6755_v54 = vld [vmem:[#allocation25_spill] sm:$0xff] }
 0x449   :  { %4799 = vmatmul.mubr.f32.gmra.mrb[14].mxu1 %v6737_v58  ;;  %v3995_v58 = vadd.f32 %v6286_v22, %v6755_v54 }
 0x44b   :  { %v3999_v34 = vmul.f32 2.0, %v3995_v58 }
 0x452   :  { %v3814_v8 = vpop.permute.xlu1 %3813 }
 0x453   :  { %v3812_v6 = vpop.permute.xlu0 %3811 }
 0x456   :  { %v3822_v52 = vpop.permute.xlu1 %3821 }
 0x457   :  { %v3820_v1 = vpop.permute.xlu0 %3819  ;;  %v3828_v63 = vsel %vm51_vm1, %v3822_v52, %v3814_v8  ;;  %v6759_v52 = vld [vmem:[#allocation26_spill] sm:$0xff] }
 0x458   :  { %v3827_v12 = vsel %vm51_vm1, %v3820_v1, %v3812_v6  ;;  %v3892_v8 = vmul.f32 8.0, %v3828_v63  ;;  %v6526_v1 = vadd.f32 %v4000_v41, %v6759_v52 }
 0x45a   :  { %v3834_v28 = vpop.permute.xlu1 %3833 }
 0x45b   :  { %v3832_v16 = vpop.permute.xlu0 %3831 }
 0x45e   :  { %v3842_v2 = vpop.permute.xlu1 %3841 }
 0x45f   :  { %v3840_v17 = vpop.permute.xlu0 %3839  ;;  %v3848_v3 = vsel %vm52_vm3, %v3842_v2, %v3834_v28  ;;  %v3891_v28 = vmul.f32 8.0, %v3827_v12 }
 0x460   :  { %v3847_v22 = vsel %vm52_vm3, %v3840_v17, %v3832_v16 }
 0x462   :  { %v3854_v60 = vpop.permute.xlu1 %3853 }
 0x463   :  { %v3852_v21 = vpop.permute.xlu0 %3851 }
 0x466   :  { %v3862_v40 = vpop.permute.xlu1 %3861 }
 0x467   :  { %v3860_v26 = vpop.permute.xlu0 %3859  ;;  %v3868_v24 = vsel %vm53_vm2, %v3862_v40, %v3854_v60 }
 0x468   :  { %v3867_v14 = vsel %vm53_vm2, %v3860_v26, %v3852_v21  ;;  %v3924_v16 = vadd.f32 %v3868_v24, %v3828_v63  ;;  %v3900_v17 = vmul.f32 8.0, %v3868_v24 }
 0x469   :  { %v3923_v2 = vadd.f32 %v3867_v14, %v3827_v12 }
 0x46a   :  { %v3874_v59 = vpop.permute.xlu1 %3873 }
 0x46b   :  { %v3872_v27 = vpop.permute.xlu0 %3871 }
 0x46e   :  { %v3882_v33 = vpop.permute.xlu1 %3881 }
 0x46f   :  { %v3880_v37 = vpop.permute.xlu0 %3879  ;;  %v6494_v9 = vsel %vm54_vm4, %v3882_v33, %v3874_v59  ;;  %v3896_v33 = vsub.f32 %v3848_v3, %v3892_v8 }
 0x470   :  { %v6498_v44 = vsel %vm54_vm4, %v3880_v37, %v3872_v27  ;;  %v3916_v25 = vadd.f32 %v6494_v9, %v3848_v3  ;;  %v3899_v37 = vmul.f32 8.0, %v3867_v14  ;;  %v6760_v3 = vld [vmem:[#allocation27_spill] sm:$0xff] }
 0x471   :  { %v3915_v10 = vadd.f32 %v6498_v44, %v3847_v22  ;;  %v6552_v4 = vadd.f32 %v3999_v34, %v6760_v3 }
 0x472   :  { %v3818_v7 = vpop.permute.xlu1 %3817  ;;  %v3920_v60 = vmul.f32 -0.083333336, %v3916_v25 }
 0x473   :  { %v3816_v19 = vpop.permute.xlu0 %3815  ;;  %v3919_v40 = vmul.f32 -0.083333336, %v3915_v10 }
 0x476   :  { %v3826_v35 = vpop.permute.xlu1 %3825 }
 0x477   :  { %v3824_v38 = vpop.permute.xlu0 %3823 }
 0x47a   :  { %v3838_v43 = vpop.permute.xlu1 %3837 }
 0x47b   :  { %v3836_v31 = vpop.permute.xlu0 %3835 }
 0x47e   :  { %v3846_v0 = vpop.permute.xlu1 %3845 }
 0x47f   :  { %v3844_v11 = vpop.permute.xlu0 %3843  ;;  %v3850_v30 = vsel %vm52_vm3, %v3846_v0, %v3838_v43  ;;  %v3928_v43 = vmul.f32 1.3333334, %v3924_v16  ;;  %v3927_v0 = vmul.f32 1.3333334, %v3923_v2 }
 0x480   :  { %v3849_v26 = vsel %vm52_vm3, %v3844_v11, %v3836_v31  ;;  %v3895_v31 = vsub.f32 %v3847_v22, %v3891_v28  ;;  %v3938_v28 = vmul.f32 2.5, %v6310_v45 }
 0x481   :  { %v3932_v58 = vadd.f32 %v3928_v43, %v3920_v60  ;;  %v3931_v41 = vadd.f32 %v3927_v0, %v3919_v40 }
 0x482   :  { %v3858_v50 = vpop.permute.xlu1 %3857 }
 0x483   :  { %v3856_v56 = vpop.permute.xlu0 %3855  ;;  %v3940_v20 = vsub.f32 %v3932_v58, %v6517_v32 }
 0x486   :  { %v3866_v13 = vpop.permute.xlu1 %3865 }
 0x487   :  { %v3864_v48 = vpop.permute.xlu0 %3863  ;;  %v3870_v21 = vsel %vm53_vm2, %v3866_v13, %v3858_v50  ;;  %v3829_v50 = vsel %vm51_vm1, %v3824_v38, %v3816_v19 }
 0x488   :  { %v3869_v59 = vsel %vm53_vm2, %v3864_v48, %v3856_v56  ;;  %v3935_v56 = vmul.f32 2.5, %v6297_v36  ;;  %v3904_v48 = vadd.f32 %v3900_v17, %v3896_v33  ;;  %v3902_v25 = vmul.f32 8.0, %v3870_v21 }
 0x489   :  { %v3925_v11 = vadd.f32 %v3869_v59, %v3829_v50 }
 0x48a   :  { %v3878_v53 = vpop.permute.xlu1 %3877  ;;  %v3908_v19 = vsub.f32 %v3904_v48, %v6494_v9  ;;  %v3939_v34 = vsub.f32 %v3931_v41, %v3935_v56 }
 0x48b   :  { %v3876_v51 = vpop.permute.xlu0 %3875  ;;  %v3929_v39 = vmul.f32 1.3333334, %v3925_v11 }
 0x48c   :  { %v3912_v2 = vmul.f32 8.333333, %v3908_v19 }
 0x48e   :  { %v3886_v18 = vpop.permute.xlu1 %3885 }
 0x48f   :  { %v3884_v46 = vpop.permute.xlu0 %3883  ;;  %v6523_v6 = vsel %vm54_vm4, %v3886_v18, %v3878_v53  ;;  %v3830_v53 = vsel %vm51_vm1, %v3826_v35, %v3818_v7  ;;  %v6549_v7 = vmul.f32 2.0, %v3997_v61  ;;  %v3903_v35 = vadd.f32 %v3899_v37, %v3895_v31 }
 0x490   :  { %v6530_v49 = vsel %vm54_vm4, %v3884_v46, %v3876_v51  ;;  %v3918_v27 = vadd.f32 %v6523_v6, %v3850_v30  ;;  %v3926_v13 = vadd.f32 %v3870_v21, %v3830_v53  ;;  %v3894_v38 = vmul.f32 8.0, %v3830_v53 }
 0x491   :  { %v3917_v42 = vadd.f32 %v6530_v49, %v3849_v26  ;;  %v3893_v18 = vmul.f32 8.0, %v3829_v50  ;;  %v3901_v46 = vmul.f32 8.0, %v3869_v59  ;;  %v3907_v10 = vsub.f32 %v3903_v35, %v6498_v44 }
 0x492   :  { %v3922_v51 = vmul.f32 -0.083333336, %v3918_v27  ;;  %v3954_v54 = vpop.permute.xlu1 %3953  ;;  %v3930_v22 = vmul.f32 1.3333334, %v3926_v13  ;;  %v3898_v8 = vsub.f32 %v3850_v30, %v3894_v38  ;;  %v3937_v44 = vmul.f32 2.5, %v6316_v29 }
 0x493   :  { %v3921_v63 = vmul.f32 -0.083333336, %v3917_v42  ;;  %v3952_v24 = vpop.permute.xlu0 %3951  ;;  %v3964_v55 = vsel %vm50_vm5, %v3954_v54, %v6292_v5  ;;  %v3897_v9 = vsub.f32 %v3849_v26, %v3893_v18  ;;  %v3960_v30 = vsel %vm50_vm5, %v6292_v5, %v3954_v54 }
 0x494   :  { %v3934_v61 = vadd.f32 %v3930_v22, %v3922_v51  ;;  %v3984_v17 = vmul.f32 %v3964_v55, %v5643_v15  ;;  %v3963_v60 = vsel %vm50_vm5, %v3952_v24, %v6297_v36  ;;  %v3906_v40 = vadd.f32 %v3902_v25, %v3898_v8 }
 0x495   :  { %v3933_v16 = vadd.f32 %v3929_v39, %v3921_v63  ;;  %v3905_v32 = vadd.f32 %v3901_v46, %v3897_v9  ;;  %v3959_v26 = vsel %vm50_vm5, %v6297_v36, %v3952_v24  ;;  %v3911_v59 = vmul.f32 8.333333, %v3907_v10 }
 0x496   :  { %v3958_v27 = vpop.permute.xlu1 %3957  ;;  %v3944_v37 = vmul.f32 10000.0, %v3940_v20  ;;  %v3943_v53 = vmul.f32 10000.0, %v3939_v34  ;;  %v3942_v42 = vsub.f32 %v3934_v61, %v3938_v28  ;;  %v3910_v43 = vsub.f32 %v3906_v40, %v6523_v6 }
 0x497   :  { %v3956_v33 = vpop.permute.xlu0 %3955  ;;  %v3909_v0 = vsub.f32 %v3905_v32, %v6530_v49  ;;  %v3983_v50 = vmul.f32 %v3963_v60, %v5643_v15  ;;  %v3941_v31 = vsub.f32 %v3933_v16, %v3937_v44  ;;  %v3988_v11 = vmul.f32 %v3984_v17, %v3912_v2  ;;  %v6761_v32 = vld [vmem:[#allocation28_spill] sm:$0xff] }
 0x498   :  { %v3972_v5 = vmul.f32 %v3960_v30, %v5635_v23  ;;  %v3971_v56 = vmul.f32 %v3959_v26, %v5635_v23  ;;  %v3962_v51 = vsel %vm50_vm5, %v6310_v45, %v3958_v27  ;;  %v3966_v6 = vsel %vm50_vm5, %v3958_v27, %v6310_v45 }
 0x499   :  { %v3961_v49 = vsel %vm50_vm5, %v6316_v29, %v3956_v33  ;;  %v3965_v58 = vsel %vm50_vm5, %v3956_v33, %v6316_v29  ;;  %v3946_v63 = vmul.f32 10000.0, %v3942_v42  ;;  %v3987_v3 = vmul.f32 %v3983_v50, %v3911_v59  ;;  %v6762_v59 = vld [vmem:[#allocation29_spill] sm:$0xff] }
 0x49a   :  { %v3945_v22 = vmul.f32 10000.0, %v3941_v31  ;;  %v3986_v45 = vmul.f32 %v3966_v6, %v5643_v15  ;;  %v3974_v24 = vmul.f32 %v3962_v51, %v5635_v23  ;;  %v3985_v57 = vmul.f32 %v3965_v58, %v5643_v15 }
 0x49b   :  { %v3973_v29 = vmul.f32 %v3961_v49, %v5635_v23  ;;  %v3914_v10 = vmul.f32 8.333333, %v3910_v43  ;;  %v3913_v61 = vmul.f32 8.333333, %v3909_v0  ;;  %v5170_v43 = vld [vmem:[%s6628_s1 + $0x10] sm:$0xff] }
 0x49d   :  { %v3990_v16 = vmul.f32 %v3986_v45, %v3914_v10  ;;  %v3989_v60 = vmul.f32 %v3985_v57, %v3913_v61 }
 0x510   :  { %v4791_v12 = vpop.f32.mrb[8].mxu1 }
 0x511   :  { %v3765_v14 = vpop.f32.mrb[9].mxu1  ;;  %v3976_v41 = vmul.f32 %v4791_v12, %v3972_v5 }
 0x512   :  { %v3975_v19 = vmul.f32 %v3971_v56, %v3765_v14 }
 0x514   :  { %v4794_v52 = vpop.f32.mrb[10].mxu1 }
 0x515   :  { %v3777_v21 = vpop.f32.mrb[11].mxu1  ;;  %v3978_v20 = vmul.f32 %v4794_v52, %v3974_v24  ;;  %v4006_v52 = vadd.f32 %v6546_v47, %v6761_v32 }
 0x516   :  { %v3977_v8 = vmul.f32 %v3973_v29, %v3777_v21  ;;  %v4005_v21 = vadd.f32 %v6549_v7, %v6762_v59 }
 0x518   :  { %v4797_v13 = vpop.f32.mrb[12].mxu1 }
 0x519   :  { %v3948_v36 = vadd.f32 %v4797_v13, %v3944_v37  ;;  %v3789_v48 = vpop.f32.mrb[13].mxu1 }
 0x51a   :  { %v3947_v54 = vadd.f32 %v3943_v53, %v3789_v48  ;;  %v5169_v53 = vld [vmem:[%s6628_s1 + $0x18] sm:$0xff] }
 0x51b   :  { %v3968_v35 = vmul.f32 %v3948_v36, %v5661_v62 }
 0x51c   :  { %v3967_v38 = vmul.f32 %v3947_v54, %v5661_v62  ;;  %v4800_v18 = vpop.f32.mrb[14].mxu1 }
 0x51d   :  { %v3980_v25 = vadd.f32 %v3976_v41, %v3968_v35  ;;  %v3950_v46 = vadd.f32 %v4800_v18, %v3946_v63  ;;  %v3801_v39 = vpop.f32.mrb[15].mxu1 }
 0x51e   :  { %v3979_v12 = vadd.f32 %v3975_v19, %v3967_v38  ;;  %v3949_v55 = vadd.f32 %v3945_v22, %v3801_v39 }
 0x51f   :  { %v3992_v14 = vadd.f32 %v3988_v11, %v3980_v25  ;;  %v3970_v34 = vmul.f32 %v3950_v46, %v5661_v62 }
 0x520   :  { %v3991_v9 = vadd.f32 %v3987_v3, %v3979_v12  ;;  %v3969_v28 = vmul.f32 %v3949_v55, %v5661_v62  ;;  %v5167_v62 = vld [vmem:[%s6628_s1 + $0x8] sm:$0xff] }
 0x521   :  { %v4008_v2 = vadd.f32 %v6526_v1, %v3992_v14  ;;  %v3982_v17 = vadd.f32 %v3978_v20, %v3970_v34 }
 0x522   :  { %v4007_v15 = vadd.f32 %v6552_v4, %v3991_v9  ;;  %v3981_v23 = vadd.f32 %v3977_v8, %v3969_v28  ;;  %v5168_v4 = vld [vmem:[%s6628_s1] sm:$0xff] }
 0x523   :  { %v4012_v44 = vmul.f32 0.083333336, %v4008_v2  ;;  %v3994_v40 = vadd.f32 %v3990_v16, %v3982_v17 }
 0x524   :  { %v4011_v30 = vmul.f32 0.083333336, %v4007_v15  ;;  %v3993_v26 = vadd.f32 %v3989_v60, %v3981_v23 }
 0x525   :  { %v4016_v1 = vadd.f32 %v5167_v62, %v4012_v44  ;;  %v4010_v27 = vadd.f32 %v4006_v52, %v3994_v40 }
 0x526   :  { %v4015_v33 = vadd.f32 %v5168_v4, %v4011_v30  ;;  %v4009_v37 = vadd.f32 %v4005_v21, %v3993_v26 }
 0x527   :  { %4020 = vst [vmem:[%s6631_s4 + $0x8] sm:$0xff] %v4016_v1  ;;  %v4014_v47 = vmul.f32 0.083333336, %v4010_v27 }
 0x528   :  { %4019 = vst [vmem:[%s6631_s4] sm:$0xff] %v4015_v33  ;;  %v4013_v7 = vmul.f32 0.083333336, %v4009_v37 }
 0x529   :  { %v4018_v42 = vadd.f32 %v5169_v53, %v4014_v47 }
 0x52a   :  { %v4017_v0 = vadd.f32 %v5170_v43, %v4013_v7 }
 0x52b   :  { %4022 = vst [vmem:[%s6631_s4 + $0x18] sm:$0xff] %v4018_v42 }
 0x52c   :  { %4021 = vst [vmem:[%s6631_s4 + $0x10] sm:$0xff] %v4017_v0 }
 0x52d   :  { %4027 = vsyncpa [#allocation3], 1 }

</bundles_post_ra>
